<compile_context>
chip_gen: v7x
topology: tpu7x:2x2x1
jax: 0.10.0
libtpu: 0.0.40
codegen_flags: <defaults>
</compile_context>

<pallas_src>
import functools

import jax
import jax.numpy as jnp
from jax.experimental import pallas as pl
from jax.experimental.pallas import tpu as pltpu


def _swish(x):
    return x * jax.nn.sigmoid(x)


def _mxu(a, w):
    """MXU dot: bf16 operands, f32 accumulation (element-wise math stays f32)."""
    return jnp.dot(a.astype(jnp.bfloat16), w.astype(jnp.bfloat16),
                   preferred_element_type=jnp.float32)


# ------------------------------------------------------------------ kernel ---

def _fused_net_kernel(x_ref,
                      stem_w_ref, stem_b_ref,
                      exp_w_ref, exp_b_ref,
                      dw_w_ref, dw_b_ref,
                      se1_w_ref, se1_b_ref,
                      se2_w_ref, se2_b_ref,
                      proj_w_ref, proj_b_ref,
                      head_w_ref, head_b_ref,
                      fc1_w_ref, fc1_b_ref,
                      fc2_w_ref, fc2_b_ref,
                      o_ref,
                      canvas_ref,
                      *, b_blk, oh, ow, c_exp):
    """Whole (reduced) network for one batch block; activations stay in VMEM/vregs."""
    m = b_blk * oh * ow
    inv_hw = 1.0 / float(oh * ow)

    # ---- stem 3x3 / stride-2: build (m, 9*cin) im2col in VMEM, one MXU dot ----
    # x_ref block: (b_blk, 2, 2, cin, PH, PW); phase[py,px][c,i,j] = xpad[c,2i+py,2j+px].
    im_rows = []
    for b in range(b_blk):
        # Hoist the 4 distinct phase loads; each is reused by several of the 9 taps.
        phases = ((x_ref[b, 0, 0], x_ref[b, 0, 1]),
                  (x_ref[b, 1, 0], x_ref[b, 1, 1]))              # each (cin, PH, PW)
        taps = []
        for ky in range(3):
            for kx in range(3):
                pv = phases[ky % 2][kx % 2]
                taps.append(pv[:, ky // 2:ky // 2 + oh, kx // 2:kx // 2 + ow])
        col3 = jnp.concatenate(taps, axis=0)                     # (9*cin, oh, ow)
        # (9*cin, oh, ow) -> (oh*ow, 9*cin): oh cheap 2-D XLU transposes + an
        # aligned sublane concat (avoids a lane-merging reshape in-kernel).
        im_rows.append(jnp.concatenate(
            [col3[:, y, :].T for y in range(oh)], axis=0))       # (oh*ow, 9*cin)
    im2col = jnp.concatenate(im_rows, axis=0)                    # (m, 9*cin)
    s = _swish(_mxu(im2col, stem_w_ref[...]) + stem_b_ref[...])  # (m, c_stem)

    # ---- MBConv expand 1x1 + swish (interior only, on the MXU) ----------------
    e = _swish(_mxu(s, exp_w_ref[...]) + exp_b_ref[...])         # (m, c_exp)

    # ---- zero-ringed VMEM canvas == 'same' zero padding for the dwconv --------
    canvas_ref[...] = jnp.zeros_like(canvas_ref)
    canvas_ref[:, 1:oh + 1, 1:ow + 1, :] = e.reshape(b_blk, oh, ow, c_exp)

    # ---- depthwise 3x3 + swish (VPU: depthwise has no MXU mapping) ------------
    dw_w = dw_w_ref[...]                                         # (9, c_exp)
    acc = jnp.zeros((b_blk, oh, ow, c_exp), jnp.float32)
    for t in range(9):
        dy, dx = t // 3, t % 3
        acc = acc + canvas_ref[:, dy:dy + oh, dx:dx + ow, :] * dw_w[t:t + 1, :]
    d = _swish(acc + dw_b_ref[...])                              # (b_blk, oh, ow, c_exp)

    # ---- squeeze-excite (single flattened-spatial reduction for the pool) -----
    pooled = jnp.sum(d.reshape(b_blk, oh * ow, c_exp), axis=1) * inv_hw  # (b_blk, c_exp)
    g = _swish(_mxu(pooled, se1_w_ref[...]) + se1_b_ref[...])
    gate = jax.nn.sigmoid(_mxu(g, se2_w_ref[...]) + se2_b_ref[...])      # (b_blk, c_exp)
    d = d * gate.reshape(b_blk, 1, 1, c_exp)

    # ---- project 1x1 (linear bottleneck) + conv head 1x1 + swish (MXU) --------
    p = _mxu(d.reshape(m, c_exp), proj_w_ref[...]) + proj_b_ref[...]     # (m, c_proj)
    h = _swish(_mxu(p, head_w_ref[...]) + head_b_ref[...])               # (m, c_head)

    # ---- classifier head -------------------------------------------------------
    # forward() applies x*sigmoid(x) AGAIN on top of the swish extract_features()
    # already applied after the conv head -- intentional double swish.
    h = _swish(h)
    feat = jnp.sum(h.reshape(b_blk, oh * ow, h.shape[-1]), axis=1) * inv_hw  # (b_blk, c_head)
    # TODO(synk): nn.Dropout(0.5) is identity in eval mode; train-mode masking omitted.
    f1 = _mxu(feat, fc1_w_ref[...]) + fc1_b_ref[...]                     # (b_blk, 128)
    logits = _mxu(f1, fc2_w_ref[...]) + fc2_b_ref[...]                   # (b_blk, 2)
    z = logits - jnp.max(logits, axis=-1, keepdims=True)
    ez = jnp.exp(z)
    probs = ez / jnp.sum(ez, axis=-1, keepdims=True)
    o_ref[...] = probs.reshape(1, b_blk, -1)                    # one store per batch block


# ------------------------------------------------------------------- model ---

def init_params(key):
    ks = jax.random.split(key, 10)
    nrm = lambda k, shp, std=0.1: std * jax.random.normal(k, shp, jnp.float32)
    p = {}
    # Stem conv 3x3 s2 (BatchNorm folded; identity at init), 3 -> 16 ch.
    p["stem_w"] = nrm(ks[0], (3 * 3 * 3, 16)); p["stem_b"] = jnp.zeros((16,), jnp.float32)
    # One MBConv stage: expand 1x1 -> depthwise 3x3 -> SE -> project 1x1.
    p["exp_w"] = nrm(ks[1], (16, 32)); p["exp_b"] = jnp.zeros((32,), jnp.float32)
    p["dw_w"] = nrm(ks[2], (3, 3, 32)); p["dw_b"] = jnp.zeros((32,), jnp.float32)
    p["se1_w"] = nrm(ks[3], (32, 8)); p["se1_b"] = jnp.zeros((8,), jnp.float32)
    p["se2_w"] = nrm(ks[4], (8, 32)); p["se2_b"] = jnp.zeros((32,), jnp.float32)
    p["proj_w"] = nrm(ks[5], (32, 24)); p["proj_b"] = jnp.zeros((24,), jnp.float32)
    # Conv head 1x1 (stand-in for the 1280-ch _conv_head at small scale): 24 -> 64.
    p["head_w"] = nrm(ks[6], (24, 64)); p["head_b"] = jnp.zeros((64,), jnp.float32)
    # fc1: initfc_type='normal' -> weight ~ N(0, 0.2), bias = 0.
    p["fc1_w"] = 0.2 * jax.random.normal(ks[7], (64, 128), jnp.float32)
    p["fc1_b"] = jnp.zeros((128,), jnp.float32)
    # fc2: PyTorch default Linear init U(-1/sqrt(fan_in), +1/sqrt(fan_in)).
    lim = 1.0 / jnp.sqrt(128.0)
    p["fc2_w"] = jax.random.uniform(ks[8], (128, 2), jnp.float32, -lim, lim)
    p["fc2_b"] = jax.random.uniform(ks[9], (2,), jnp.float32, -lim, lim)
    return p


def _pick_batch_block(batch):
    """Largest batch block (<=8) that still leaves >=2 grid steps (both v7x TCs)."""
    cap = min(8, max(1, batch // 2))
    for d in range(cap, 0, -1):
        if batch % d == 0:
            return d
    return 1


def my_efficientnet_b0_forward(params, x_nchw, batch_block=None):
    x = x_nchw.astype(jnp.float32)                               # (B, Cin, H, W)
    B, Cin, H, W = x.shape
    OH, OW = H // 2, W // 2                                      # stride-2 stem output
    PH, PW = OH + 1, OW + 1                                      # per-phase spatial extent

    b_blk = _pick_batch_block(B) if batch_block is None else batch_block
    assert B % b_blk == 0
    grid_len = B // b_blk

    c_exp = params["exp_w"].shape[1]
    num_cls = params["fc2_w"].shape[1]

    # TF-style SAME padding for the stride-2 3x3 stem (EfficientNet's
    # Conv2dStaticSamePadding): pad 0 before / 1 after on H and W.  The second
    # trailing zero row/col only exists so all 4 stride-2 phases share one
    # (PH, PW) extent; it is never read by a valid tap.
    xpad = jnp.pad(x, ((0, 0), (0, 0), (0, 2), (0, 2)))          # (B, Cin, H+2, W+2)
    # Stride-2 phase decomposition, channel-first so PW sits in the lane dim
    # (~1x the input bytes; no 9x HBM im2col):
    #   ph[b, py, px, c, i, j] == xpad[b, c, 2i+py, 2j+px]
    ph = xpad.reshape(B, Cin, PH, 2, PW, 2).transpose(0, 3, 5, 1, 2, 4)

    ops = [
        ph,
        params["stem_w"], params["stem_b"].reshape(1, -1),
        params["exp_w"], params["exp_b"].reshape(1, -1),
        params["dw_w"].reshape(9, -1), params["dw_b"].reshape(1, -1),
        params["se1_w"], params["se1_b"].reshape(1, -1),
        params["se2_w"], params["se2_b"].reshape(1, -1),
        params["proj_w"], params["proj_b"].reshape(1, -1),
        params["head_w"], params["head_b"].reshape(1, -1),
        params["fc1_w"], params["fc1_b"].reshape(1, -1),
        params["fc2_w"], params["fc2_b"].reshape(1, -1),
    ]

    # TODO(synk): at real EfficientNet-B0 weight sizes the 18 constant-index
    # weight/bias operands should be single-buffered (pl.Buffered(1)) or merged
    # into a few concatenated arrays to save v7x VMEM; at these toy sizes the
    # default double-buffering costs <100 KB.
    def full_spec(a):
        nd = a.ndim
        return pl.BlockSpec(a.shape, lambda g, _nd=nd: (0,) * _nd)

    in_specs = [pl.BlockSpec((b_blk, 2, 2, Cin, PH, PW),
                             lambda g: (g, 0, 0, 0, 0, 0))] + \
               [full_spec(a) for a in ops[1:]]

    kernel = functools.partial(
        _fused_net_kernel, b_blk=b_blk, oh=OH, ow=OW, c_exp=c_exp)

    out = pl.pallas_call(
        kernel,
        out_shape=jax.ShapeDtypeStruct((grid_len, b_blk, num_cls), jnp.float32),
        grid=(grid_len,),
        in_specs=in_specs,
        out_specs=pl.BlockSpec((1, b_blk, num_cls), lambda g: (g, 0, 0)),
        scratch_shapes=[pltpu.VMEM((b_blk, OH + 2, OW + 2, c_exp), jnp.float32)],
        compiler_params=pltpu.CompilerParams(
            dimension_semantics=("parallel",),
            vmem_limit_bytes=32 * 1024 * 1024),
    )(*ops)
    return out.reshape(B, num_cls)


if __name__ == "__main__":
    key = jax.random.PRNGKey(0)
    pkey, xkey = jax.random.split(key)
    params = init_params(pkey)
    x = jax.random.normal(xkey, (2, 3, 16, 16), jnp.float32)     # NCHW, like PyTorch
    fwd = jax.jit(my_efficientnet_b0_forward)
    out = jax.block_until_ready(fwd(params, x))
    assert out.shape == (2, 2)
    assert jnp.allclose(jnp.sum(out, axis=1), 1.0, atol=1e-5)
    print("KERNEL_OK")
</pallas_src>

<mosaic_0001>
module attributes {stable_mosaic.version = 11 : i64} {
  func.func @_fused_net_kernel(%arg0: i32, %arg1: memref<1x2x2x3x9x9xf32, #tpu.memory_space<vmem>>, %arg2: memref<27x16xf32, #tpu.memory_space<vmem>>, %arg3: memref<1x16xf32, #tpu.memory_space<vmem>>, %arg4: memref<16x32xf32, #tpu.memory_space<vmem>>, %arg5: memref<1x32xf32, #tpu.memory_space<vmem>>, %arg6: memref<9x32xf32, #tpu.memory_space<vmem>>, %arg7: memref<1x32xf32, #tpu.memory_space<vmem>>, %arg8: memref<32x8xf32, #tpu.memory_space<vmem>>, %arg9: memref<1x8xf32, #tpu.memory_space<vmem>>, %arg10: memref<8x32xf32, #tpu.memory_space<vmem>>, %arg11: memref<1x32xf32, #tpu.memory_space<vmem>>, %arg12: memref<32x24xf32, #tpu.memory_space<vmem>>, %arg13: memref<1x24xf32, #tpu.memory_space<vmem>>, %arg14: memref<24x64xf32, #tpu.memory_space<vmem>>, %arg15: memref<1x64xf32, #tpu.memory_space<vmem>>, %arg16: memref<64x128xf32, #tpu.memory_space<vmem>>, %arg17: memref<1x128xf32, #tpu.memory_space<vmem>>, %arg18: memref<128x2xf32, #tpu.memory_space<vmem>>, %arg19: memref<1x2xf32, #tpu.memory_space<vmem>>, %arg20: memref<1x1x2xf32, #tpu.memory_space<vmem>>, %arg21: memref<1x10x10x32xf32, #tpu.memory_space<vmem>>) attributes {dimension_semantics = [#tpu.dimension_semantics<parallel>], iteration_bounds = array<i64: 2>, scalar_prefetch = 0 : i64, scratch_operands = 1 : i64, tpu.core_type = #tpu.core_type<tc>, window_params = [{transform_indices = @transform_0, window_bounds = array<i64: 1, 2, 2, 3, 9, 9>}, {pipeline_mode = #tpu.pipeline_mode<synchronous>, transform_indices = @transform_1, window_bounds = array<i64: 27, 16>}, {pipeline_mode = #tpu.pipeline_mode<synchronous>, transform_indices = @transform_2, window_bounds = array<i64: 1, 16>}, {pipeline_mode = #tpu.pipeline_mode<synchronous>, transform_indices = @transform_3, window_bounds = array<i64: 16, 32>}, {pipeline_mode = #tpu.pipeline_mode<synchronous>, transform_indices = @transform_4, window_bounds = array<i64: 1, 32>}, {pipeline_mode = #tpu.pipeline_mode<synchronous>, transform_indices = @transform_5, window_bounds = array<i64: 9, 32>}, {pipeline_mode = #tpu.pipeline_mode<synchronous>, transform_indices = @transform_6, window_bounds = array<i64: 1, 32>}, {pipeline_mode = #tpu.pipeline_mode<synchronous>, transform_indices = @transform_7, window_bounds = array<i64: 32, 8>}, {pipeline_mode = #tpu.pipeline_mode<synchronous>, transform_indices = @transform_8, window_bounds = array<i64: 1, 8>}, {pipeline_mode = #tpu.pipeline_mode<synchronous>, transform_indices = @transform_9, window_bounds = array<i64: 8, 32>}, {pipeline_mode = #tpu.pipeline_mode<synchronous>, transform_indices = @transform_10, window_bounds = array<i64: 1, 32>}, {pipeline_mode = #tpu.pipeline_mode<synchronous>, transform_indices = @transform_11, window_bounds = array<i64: 32, 24>}, {pipeline_mode = #tpu.pipeline_mode<synchronous>, transform_indices = @transform_12, window_bounds = array<i64: 1, 24>}, {pipeline_mode = #tpu.pipeline_mode<synchronous>, transform_indices = @transform_13, window_bounds = array<i64: 24, 64>}, {pipeline_mode = #tpu.pipeline_mode<synchronous>, transform_indices = @transform_14, window_bounds = array<i64: 1, 64>}, {pipeline_mode = #tpu.pipeline_mode<synchronous>, transform_indices = @transform_15, window_bounds = array<i64: 64, 128>}, {pipeline_mode = #tpu.pipeline_mode<synchronous>, transform_indices = @transform_16, window_bounds = array<i64: 1, 128>}, {pipeline_mode = #tpu.pipeline_mode<synchronous>, transform_indices = @transform_17, window_bounds = array<i64: 128, 2>}, {pipeline_mode = #tpu.pipeline_mode<synchronous>, transform_indices = @transform_18, window_bounds = array<i64: 1, 2>}, {transform_indices = @transform_19, window_bounds = array<i64: 1, 1, 2>}]} {
    %c0 = arith.constant 0 : index
    %c0_0 = arith.constant 0 : index
    %c0_1 = arith.constant 0 : index
    %c0_2 = arith.constant 0 : index
    %c0_3 = arith.constant 0 : index
    %c0_4 = arith.constant 0 : index
    %0 = vector.load %arg1[%c0, %c0_0, %c0_1, %c0_2, %c0_3, %c0_4] : memref<1x2x2x3x9x9xf32, #tpu.memory_space<vmem>>, vector<1x1x1x3x9x9xf32>
    %1 = vector.shape_cast %0 : vector<1x1x1x3x9x9xf32> to vector<3x9x9xf32>
    %c0_5 = arith.constant 0 : index
    %c0_6 = arith.constant 0 : index
    %c1 = arith.constant 1 : index
    %c0_7 = arith.constant 0 : index
    %c0_8 = arith.constant 0 : index
    %c0_9 = arith.constant 0 : index
    %2 = vector.load %arg1[%c0_5, %c0_6, %c1, %c0_7, %c0_8, %c0_9] : memref<1x2x2x3x9x9xf32, #tpu.memory_space<vmem>>, vector<1x1x1x3x9x9xf32>
    %3 = vector.shape_cast %2 : vector<1x1x1x3x9x9xf32> to vector<3x9x9xf32>
    %c0_10 = arith.constant 0 : index
    %c1_11 = arith.constant 1 : index
    %c0_12 = arith.constant 0 : index
    %c0_13 = arith.constant 0 : index
    %c0_14 = arith.constant 0 : index
    %c0_15 = arith.constant 0 : index
    %4 = vector.load %arg1[%c0_10, %c1_11, %c0_12, %c0_13, %c0_14, %c0_15] : memref<1x2x2x3x9x9xf32, #tpu.memory_space<vmem>>, vector<1x1x1x3x9x9xf32>
    %5 = vector.shape_cast %4 : vector<1x1x1x3x9x9xf32> to vector<3x9x9xf32>
    %c0_16 = arith.constant 0 : index
    %c1_17 = arith.constant 1 : index
    %c1_18 = arith.constant 1 : index
    %c0_19 = arith.constant 0 : index
    %c0_20 = arith.constant 0 : index
    %c0_21 = arith.constant 0 : index
    %6 = vector.load %arg1[%c0_16, %c1_17, %c1_18, %c0_19, %c0_20, %c0_21] : memref<1x2x2x3x9x9xf32, #tpu.memory_space<vmem>>, vector<1x1x1x3x9x9xf32>
    %7 = vector.shape_cast %6 : vector<1x1x1x3x9x9xf32> to vector<3x9x9xf32>
    %8 = vector.extract_strided_slice %1 {offsets = [0, 0, 0], sizes = [3, 8, 8], strides = [1, 1, 1]} : vector<3x9x9xf32> to vector<3x8x8xf32>
    %9 = vector.extract_strided_slice %3 {offsets = [0, 0, 0], sizes = [3, 8, 8], strides = [1, 1, 1]} : vector<3x9x9xf32> to vector<3x8x8xf32>
    %10 = vector.extract_strided_slice %1 {offsets = [0, 0, 1], sizes = [3, 8, 8], strides = [1, 1, 1]} : vector<3x9x9xf32> to vector<3x8x8xf32>
    %11 = vector.extract_strided_slice %5 {offsets = [0, 0, 0], sizes = [3, 8, 8], strides = [1, 1, 1]} : vector<3x9x9xf32> to vector<3x8x8xf32>
    %12 = vector.extract_strided_slice %7 {offsets = [0, 0, 0], sizes = [3, 8, 8], strides = [1, 1, 1]} : vector<3x9x9xf32> to vector<3x8x8xf32>
    %13 = vector.extract_strided_slice %5 {offsets = [0, 0, 1], sizes = [3, 8, 8], strides = [1, 1, 1]} : vector<3x9x9xf32> to vector<3x8x8xf32>
    %14 = vector.extract_strided_slice %1 {offsets = [0, 1, 0], sizes = [3, 8, 8], strides = [1, 1, 1]} : vector<3x9x9xf32> to vector<3x8x8xf32>
    %15 = vector.extract_strided_slice %3 {offsets = [0, 1, 0], sizes = [3, 8, 8], strides = [1, 1, 1]} : vector<3x9x9xf32> to vector<3x8x8xf32>
    %16 = vector.extract_strided_slice %1 {offsets = [0, 1, 1], sizes = [3, 8, 8], strides = [1, 1, 1]} : vector<3x9x9xf32> to vector<3x8x8xf32>
    %17 = tpu.concatenate %8, %9, %10, %11, %12, %13, %14, %15, %16 in 0 : vector<3x8x8xf32>, vector<3x8x8xf32>, vector<3x8x8xf32>, vector<3x8x8xf32>, vector<3x8x8xf32>, vector<3x8x8xf32>, vector<3x8x8xf32>, vector<3x8x8xf32>, vector<3x8x8xf32> -> vector<27x8x8xf32>
    %18 = vector.extract_strided_slice %17 {offsets = [0, 0, 0], sizes = [27, 1, 8], strides = [1, 1, 1]} : vector<27x8x8xf32> to vector<27x1x8xf32>
    %19 = vector.shape_cast %18 : vector<27x1x8xf32> to vector<27x8xf32>
    %20 = tpu.transpose %19, [1, 0] : vector<27x8xf32> -> vector<8x27xf32>
    %21 = vector.extract_strided_slice %17 {offsets = [0, 1, 0], sizes = [27, 1, 8], strides = [1, 1, 1]} : vector<27x8x8xf32> to vector<27x1x8xf32>
    %22 = vector.shape_cast %21 : vector<27x1x8xf32> to vector<27x8xf32>
    %23 = tpu.transpose %22, [1, 0] : vector<27x8xf32> -> vector<8x27xf32>
    %24 = vector.extract_strided_slice %17 {offsets = [0, 2, 0], sizes = [27, 1, 8], strides = [1, 1, 1]} : vector<27x8x8xf32> to vector<27x1x8xf32>
    %25 = vector.shape_cast %24 : vector<27x1x8xf32> to vector<27x8xf32>
    %26 = tpu.transpose %25, [1, 0] : vector<27x8xf32> -> vector<8x27xf32>
    %27 = vector.extract_strided_slice %17 {offsets = [0, 3, 0], sizes = [27, 1, 8], strides = [1, 1, 1]} : vector<27x8x8xf32> to vector<27x1x8xf32>
    %28 = vector.shape_cast %27 : vector<27x1x8xf32> to vector<27x8xf32>
    %29 = tpu.transpose %28, [1, 0] : vector<27x8xf32> -> vector<8x27xf32>
    %30 = vector.extract_strided_slice %17 {offsets = [0, 4, 0], sizes = [27, 1, 8], strides = [1, 1, 1]} : vector<27x8x8xf32> to vector<27x1x8xf32>
    %31 = vector.shape_cast %30 : vector<27x1x8xf32> to vector<27x8xf32>
    %32 = tpu.transpose %31, [1, 0] : vector<27x8xf32> -> vector<8x27xf32>
    %33 = vector.extract_strided_slice %17 {offsets = [0, 5, 0], sizes = [27, 1, 8], strides = [1, 1, 1]} : vector<27x8x8xf32> to vector<27x1x8xf32>
    %34 = vector.shape_cast %33 : vector<27x1x8xf32> to vector<27x8xf32>
    %35 = tpu.transpose %34, [1, 0] : vector<27x8xf32> -> vector<8x27xf32>
    %36 = vector.extract_strided_slice %17 {offsets = [0, 6, 0], sizes = [27, 1, 8], strides = [1, 1, 1]} : vector<27x8x8xf32> to vector<27x1x8xf32>
    %37 = vector.shape_cast %36 : vector<27x1x8xf32> to vector<27x8xf32>
    %38 = tpu.transpose %37, [1, 0] : vector<27x8xf32> -> vector<8x27xf32>
    %39 = vector.extract_strided_slice %17 {offsets = [0, 7, 0], sizes = [27, 1, 8], strides = [1, 1, 1]} : vector<27x8x8xf32> to vector<27x1x8xf32>
    %40 = vector.shape_cast %39 : vector<27x1x8xf32> to vector<27x8xf32>
    %41 = tpu.transpose %40, [1, 0] : vector<27x8xf32> -> vector<8x27xf32>
    %42 = tpu.concatenate %20, %23, %26, %29, %32, %35, %38, %41 in 0 : vector<8x27xf32>, vector<8x27xf32>, vector<8x27xf32>, vector<8x27xf32>, vector<8x27xf32>, vector<8x27xf32>, vector<8x27xf32>, vector<8x27xf32> -> vector<64x27xf32>
    %c0_22 = arith.constant 0 : index
    %c0_23 = arith.constant 0 : index
    %43 = vector.load %arg2[%c0_22, %c0_23] : memref<27x16xf32, #tpu.memory_space<vmem>>, vector<27x16xf32>
    %44 = arith.truncf %42 : vector<64x27xf32> to vector<64x27xbf16>
    %45 = arith.truncf %43 : vector<27x16xf32> to vector<27x16xbf16>
    %cst = arith.constant dense<0.000000e+00> : vector<64x16xf32>
    %46 = tpu.matmul %44, %45, %cst {dimension_numbers = #tpu.dot_dimension_numbers<[1], [0], [0], [1], [0, 0, 1, 1], [], []>} : vector<64x27xbf16>, vector<27x16xbf16>, vector<64x16xf32> -> vector<64x16xf32>
    %c0_24 = arith.constant 0 : index
    %c0_25 = arith.constant 0 : index
    %47 = vector.load %arg3[%c0_24, %c0_25] : memref<1x16xf32, #tpu.memory_space<vmem>>, vector<1x16xf32>
    %48 = vector.broadcast %47 : vector<1x16xf32> to vector<64x16xf32>
    %49 = arith.addf %46, %48 : vector<64x16xf32>
    %50 = arith.negf %49 : vector<64x16xf32>
    %51 = math.exp %50 : vector<64x16xf32>
    %cst_26 = arith.constant 1.000000e+00 : f32
    %52 = vector.broadcast %cst_26 : f32 to vector<64x16xf32>
    %53 = arith.addf %52, %51 : vector<64x16xf32>
    %54 = arith.divf %52, %53 : vector<64x16xf32>
    %55 = arith.mulf %49, %54 : vector<64x16xf32>
    %c0_27 = arith.constant 0 : index
    %c0_28 = arith.constant 0 : index
    %56 = vector.load %arg4[%c0_27, %c0_28] : memref<16x32xf32, #tpu.memory_space<vmem>>, vector<16x32xf32>
    %57 = arith.truncf %55 : vector<64x16xf32> to vector<64x16xbf16>
    %58 = arith.truncf %56 : vector<16x32xf32> to vector<16x32xbf16>
    %cst_29 = arith.constant dense<0.000000e+00> : vector<64x32xf32>
    %59 = tpu.matmul %57, %58, %cst_29 {dimension_numbers = #tpu.dot_dimension_numbers<[1], [0], [0], [1], [0, 0, 1, 1], [], []>} : vector<64x16xbf16>, vector<16x32xbf16>, vector<64x32xf32> -> vector<64x32xf32>
    %c0_30 = arith.constant 0 : index
    %c0_31 = arith.constant 0 : index
    %60 = vector.load %arg5[%c0_30, %c0_31] : memref<1x32xf32, #tpu.memory_space<vmem>>, vector<1x32xf32>
    %61 = vector.broadcast %60 : vector<1x32xf32> to vector<64x32xf32>
    %62 = arith.addf %59, %61 : vector<64x32xf32>
    %63 = arith.negf %62 : vector<64x32xf32>
    %64 = math.exp %63 : vector<64x32xf32>
    %cst_32 = arith.constant 1.000000e+00 : f32
    %65 = vector.broadcast %cst_32 : f32 to vector<64x32xf32>
    %66 = arith.addf %65, %64 : vector<64x32xf32>
    %67 = arith.divf %65, %66 : vector<64x32xf32>
    %68 = arith.mulf %62, %67 : vector<64x32xf32>
    %cst_33 = arith.constant 0.000000e+00 : f32
    %69 = vector.broadcast %cst_33 : f32 to vector<1x10x10x32xf32>
    %c0_34 = arith.constant 0 : index
    %c0_35 = arith.constant 0 : index
    %c0_36 = arith.constant 0 : index
    %c0_37 = arith.constant 0 : index
    %70 = vector.load %arg21[%c0_34, %c0_35, %c0_36, %c0_37] : memref<1x10x10x32xf32, #tpu.memory_space<vmem>>, vector<1x10x10x32xf32>
    tpu.vector_store %arg21[%c0_34, %c0_35, %c0_36, %c0_37], %69 {strides = array<i32>} : memref<1x10x10x32xf32, #tpu.memory_space<vmem>>, vector<1x10x10x32xf32>,
    %71 = vector.shape_cast %68 : vector<64x32xf32> to vector<1x8x8x32xf32>
    %c0_38 = arith.constant 0 : index
    %c1_39 = arith.constant 1 : index
    %c1_40 = arith.constant 1 : index
    %c0_41 = arith.constant 0 : index
    %72 = vector.load %arg21[%c0_38, %c1_39, %c1_40, %c0_41] : memref<1x10x10x32xf32, #tpu.memory_space<vmem>>, vector<1x8x8x32xf32>
    tpu.vector_store %arg21[%c0_38, %c1_39, %c1_40, %c0_41], %71 {strides = array<i32>} : memref<1x10x10x32xf32, #tpu.memory_space<vmem>>, vector<1x8x8x32xf32>,
    %c0_42 = arith.constant 0 : index
    %c0_43 = arith.constant 0 : index
    %73 = vector.load %arg6[%c0_42, %c0_43] : memref<9x32xf32, #tpu.memory_space<vmem>>, vector<9x32xf32>
    %cst_44 = arith.constant 0.000000e+00 : f32
    %74 = vector.broadcast %cst_44 : f32 to vector<1x8x8x32xf32>
    %c0_45 = arith.constant 0 : index
    %c0_46 = arith.constant 0 : index
    %c0_47 = arith.constant 0 : index
    %c0_48 = arith.constant 0 : index
    %75 = vector.load %arg21[%c0_45, %c0_46, %c0_47, %c0_48] : memref<1x10x10x32xf32, #tpu.memory_space<vmem>>, vector<1x8x8x32xf32>
    %76 = vector.extract_strided_slice %73 {offsets = [0, 0], sizes = [1, 32], strides = [1, 1]} : vector<9x32xf32> to vector<1x32xf32>
    %77 = vector.shape_cast %76 : vector<1x32xf32> to vector<1x1x1x32xf32>
    %78 = vector.broadcast %77 : vector<1x1x1x32xf32> to vector<1x8x8x32xf32>
    %79 = arith.mulf %75, %78 : vector<1x8x8x32xf32>
    %80 = arith.addf %74, %79 : vector<1x8x8x32xf32>
    %c0_49 = arith.constant 0 : index
    %c0_50 = arith.constant 0 : index
    %c1_51 = arith.constant 1 : index
    %c0_52 = arith.constant 0 : index
    %81 = vector.load %arg21[%c0_49, %c0_50, %c1_51, %c0_52] : memref<1x10x10x32xf32, #tpu.memory_space<vmem>>, vector<1x8x8x32xf32>
    %82 = vector.extract_strided_slice %73 {offsets = [1, 0], sizes = [1, 32], strides = [1, 1]} : vector<9x32xf32> to vector<1x32xf32>
    %83 = vector.shape_cast %82 : vector<1x32xf32> to vector<1x1x1x32xf32>
    %84 = vector.broadcast %83 : vector<1x1x1x32xf32> to vector<1x8x8x32xf32>
    %85 = arith.mulf %81, %84 : vector<1x8x8x32xf32>
    %86 = arith.addf %80, %85 : vector<1x8x8x32xf32>
    %c0_53 = arith.constant 0 : index
    %c0_54 = arith.constant 0 : index
    %c2 = arith.constant 2 : index
    %c0_55 = arith.constant 0 : index
    %87 = vector.load %arg21[%c0_53, %c0_54, %c2, %c0_55] : memref<1x10x10x32xf32, #tpu.memory_space<vmem>>, vector<1x8x8x32xf32>
    %88 = vector.extract_strided_slice %73 {offsets = [2, 0], sizes = [1, 32], strides = [1, 1]} : vector<9x32xf32> to vector<1x32xf32>
    %89 = vector.shape_cast %88 : vector<1x32xf32> to vector<1x1x1x32xf32>
    %90 = vector.broadcast %89 : vector<1x1x1x32xf32> to vector<1x8x8x32xf32>
    %91 = arith.mulf %87, %90 : vector<1x8x8x32xf32>
    %92 = arith.addf %86, %91 : vector<1x8x8x32xf32>
    %c0_56 = arith.constant 0 : index
    %c1_57 = arith.constant 1 : index
    %c0_58 = arith.constant 0 : index
    %c0_59 = arith.constant 0 : index
    %93 = vector.load %arg21[%c0_56, %c1_57, %c0_58, %c0_59] : memref<1x10x10x32xf32, #tpu.memory_space<vmem>>, vector<1x8x8x32xf32>
    %94 = vector.extract_strided_slice %73 {offsets = [3, 0], sizes = [1, 32], strides = [1, 1]} : vector<9x32xf32> to vector<1x32xf32>
    %95 = vector.shape_cast %94 : vector<1x32xf32> to vector<1x1x1x32xf32>
    %96 = vector.broadcast %95 : vector<1x1x1x32xf32> to vector<1x8x8x32xf32>
    %97 = arith.mulf %93, %96 : vector<1x8x8x32xf32>
    %98 = arith.addf %92, %97 : vector<1x8x8x32xf32>
    %c0_60 = arith.constant 0 : index
    %c1_61 = arith.constant 1 : index
    %c1_62 = arith.constant 1 : index
    %c0_63 = arith.constant 0 : index
    %99 = vector.load %arg21[%c0_60, %c1_61, %c1_62, %c0_63] : memref<1x10x10x32xf32, #tpu.memory_space<vmem>>, vector<1x8x8x32xf32>
    %100 = vector.extract_strided_slice %73 {offsets = [4, 0], sizes = [1, 32], strides = [1, 1]} : vector<9x32xf32> to vector<1x32xf32>
    %101 = vector.shape_cast %100 : vector<1x32xf32> to vector<1x1x1x32xf32>
    %102 = vector.broadcast %101 : vector<1x1x1x32xf32> to vector<1x8x8x32xf32>
    %103 = arith.mulf %99, %102 : vector<1x8x8x32xf32>
    %104 = arith.addf %98, %103 : vector<1x8x8x32xf32>
    %c0_64 = arith.constant 0 : index
    %c1_65 = arith.constant 1 : index
    %c2_66 = arith.constant 2 : index
    %c0_67 = arith.constant 0 : index
    %105 = vector.load %arg21[%c0_64, %c1_65, %c2_66, %c0_67] : memref<1x10x10x32xf32, #tpu.memory_space<vmem>>, vector<1x8x8x32xf32>
    %106 = vector.extract_strided_slice %73 {offsets = [5, 0], sizes = [1, 32], strides = [1, 1]} : vector<9x32xf32> to vector<1x32xf32>
    %107 = vector.shape_cast %106 : vector<1x32xf32> to vector<1x1x1x32xf32>
    %108 = vector.broadcast %107 : vector<1x1x1x32xf32> to vector<1x8x8x32xf32>
    %109 = arith.mulf %105, %108 : vector<1x8x8x32xf32>
    %110 = arith.addf %104, %109 : vector<1x8x8x32xf32>
    %c0_68 = arith.constant 0 : index
    %c2_69 = arith.constant 2 : index
    %c0_70 = arith.constant 0 : index
    %c0_71 = arith.constant 0 : index
    %111 = vector.load %arg21[%c0_68, %c2_69, %c0_70, %c0_71] : memref<1x10x10x32xf32, #tpu.memory_space<vmem>>, vector<1x8x8x32xf32>
    %112 = vector.extract_strided_slice %73 {offsets = [6, 0], sizes = [1, 32], strides = [1, 1]} : vector<9x32xf32> to vector<1x32xf32>
    %113 = vector.shape_cast %112 : vector<1x32xf32> to vector<1x1x1x32xf32>
    %114 = vector.broadcast %113 : vector<1x1x1x32xf32> to vector<1x8x8x32xf32>
    %115 = arith.mulf %111, %114 : vector<1x8x8x32xf32>
    %116 = arith.addf %110, %115 : vector<1x8x8x32xf32>
    %c0_72 = arith.constant 0 : index
    %c2_73 = arith.constant 2 : index
    %c1_74 = arith.constant 1 : index
    %c0_75 = arith.constant 0 : index
    %117 = vector.load %arg21[%c0_72, %c2_73, %c1_74, %c0_75] : memref<1x10x10x32xf32, #tpu.memory_space<vmem>>, vector<1x8x8x32xf32>
    %118 = vector.extract_strided_slice %73 {offsets = [7, 0], sizes = [1, 32], strides = [1, 1]} : vector<9x32xf32> to vector<1x32xf32>
    %119 = vector.shape_cast %118 : vector<1x32xf32> to vector<1x1x1x32xf32>
    %120 = vector.broadcast %119 : vector<1x1x1x32xf32> to vector<1x8x8x32xf32>
    %121 = arith.mulf %117, %120 : vector<1x8x8x32xf32>
    %122 = arith.addf %116, %121 : vector<1x8x8x32xf32>
    %c0_76 = arith.constant 0 : index
    %c2_77 = arith.constant 2 : index
    %c2_78 = arith.constant 2 : index
    %c0_79 = arith.constant 0 : index
    %123 = vector.load %arg21[%c0_76, %c2_77, %c2_78, %c0_79] : memref<1x10x10x32xf32, #tpu.memory_space<vmem>>, vector<1x8x8x32xf32>
    %124 = vector.extract_strided_slice %73 {offsets = [8, 0], sizes = [1, 32], strides = [1, 1]} : vector<9x32xf32> to vector<1x32xf32>
    %125 = vector.shape_cast %124 : vector<1x32xf32> to vector<1x1x1x32xf32>
    %126 = vector.broadcast %125 : vector<1x1x1x32xf32> to vector<1x8x8x32xf32>
    %127 = arith.mulf %123, %126 : vector<1x8x8x32xf32>
    %128 = arith.addf %122, %127 : vector<1x8x8x32xf32>
    %c0_80 = arith.constant 0 : index
    %c0_81 = arith.constant 0 : index
    %129 = vector.load %arg7[%c0_80, %c0_81] : memref<1x32xf32, #tpu.memory_space<vmem>>, vector<1x32xf32>
    %130 = vector.shape_cast %129 : vector<1x32xf32> to vector<1x1x1x32xf32>
    %131 = vector.broadcast %130 : vector<1x1x1x32xf32> to vector<1x8x8x32xf32>
    %132 = arith.addf %128, %131 : vector<1x8x8x32xf32>
    %133 = arith.negf %132 : vector<1x8x8x32xf32>
    %134 = math.exp %133 : vector<1x8x8x32xf32>
    %cst_82 = arith.constant 1.000000e+00 : f32
    %135 = vector.broadcast %cst_82 : f32 to vector<1x8x8x32xf32>
    %136 = arith.addf %135, %134 : vector<1x8x8x32xf32>
    %137 = arith.divf %135, %136 : vector<1x8x8x32xf32>
    %138 = arith.mulf %132, %137 : vector<1x8x8x32xf32>
    %139 = vector.shape_cast %138 : vector<1x8x8x32xf32> to vector<1x64x32xf32>
    %cst_83 = arith.constant dense<0.000000e+00> : vector<1x32xf32>
    %140 = vector.multi_reduction <add>, %139, %cst_83 [1] : vector<1x64x32xf32> to vector<1x32xf32>
    %cst_84 = arith.constant 1.562500e-02 : f32
    %141 = vector.broadcast %cst_84 : f32 to vector<1x32xf32>
    %142 = arith.mulf %140, %141 : vector<1x32xf32>
    %c0_85 = arith.constant 0 : index
    %c0_86 = arith.constant 0 : index
    %143 = vector.load %arg8[%c0_85, %c0_86] : memref<32x8xf32, #tpu.memory_space<vmem>>, vector<32x8xf32>
    %144 = arith.truncf %142 : vector<1x32xf32> to vector<1x32xbf16>
    %145 = arith.truncf %143 : vector<32x8xf32> to vector<32x8xbf16>
    %cst_87 = arith.constant dense<0.000000e+00> : vector<1x8xf32>
    %146 = tpu.matmul %144, %145, %cst_87 {dimension_numbers = #tpu.dot_dimension_numbers<[1], [0], [0], [1], [0, 0, 1, 1], [], []>} : vector<1x32xbf16>, vector<32x8xbf16>, vector<1x8xf32> -> vector<1x8xf32>
    %c0_88 = arith.constant 0 : index
    %c0_89 = arith.constant 0 : index
    %147 = vector.load %arg9[%c0_88, %c0_89] : memref<1x8xf32, #tpu.memory_space<vmem>>, vector<1x8xf32>
    %148 = arith.addf %146, %147 : vector<1x8xf32>
    %149 = arith.negf %148 : vector<1x8xf32>
    %150 = math.exp %149 : vector<1x8xf32>
    %cst_90 = arith.constant 1.000000e+00 : f32
    %151 = vector.broadcast %cst_90 : f32 to vector<1x8xf32>
    %152 = arith.addf %151, %150 : vector<1x8xf32>
    %153 = arith.divf %151, %152 : vector<1x8xf32>
    %154 = arith.mulf %148, %153 : vector<1x8xf32>
    %c0_91 = arith.constant 0 : index
    %c0_92 = arith.constant 0 : index
    %155 = vector.load %arg10[%c0_91, %c0_92] : memref<8x32xf32, #tpu.memory_space<vmem>>, vector<8x32xf32>
    %156 = arith.truncf %154 : vector<1x8xf32> to vector<1x8xbf16>
    %157 = arith.truncf %155 : vector<8x32xf32> to vector<8x32xbf16>
    %cst_93 = arith.constant dense<0.000000e+00> : vector<1x32xf32>
    %158 = tpu.matmul %156, %157, %cst_93 {dimension_numbers = #tpu.dot_dimension_numbers<[1], [0], [0], [1], [0, 0, 1, 1], [], []>} : vector<1x8xbf16>, vector<8x32xbf16>, vector<1x32xf32> -> vector<1x32xf32>
    %c0_94 = arith.constant 0 : index
    %c0_95 = arith.constant 0 : index
    %159 = vector.load %arg11[%c0_94, %c0_95] : memref<1x32xf32, #tpu.memory_space<vmem>>, vector<1x32xf32>
    %160 = arith.addf %158, %159 : vector<1x32xf32>
    %161 = arith.negf %160 : vector<1x32xf32>
    %162 = math.exp %161 : vector<1x32xf32>
    %cst_96 = arith.constant 1.000000e+00 : f32
    %163 = vector.broadcast %cst_96 : f32 to vector<1x32xf32>
    %164 = arith.addf %163, %162 : vector<1x32xf32>
    %165 = arith.divf %163, %164 : vector<1x32xf32>
    %166 = vector.shape_cast %165 : vector<1x32xf32> to vector<1x1x1x32xf32>
    %167 = vector.broadcast %166 : vector<1x1x1x32xf32> to vector<1x8x8x32xf32>
    %168 = arith.mulf %138, %167 : vector<1x8x8x32xf32>
    %169 = vector.shape_cast %168 : vector<1x8x8x32xf32> to vector<64x32xf32>
    %c0_97 = arith.constant 0 : index
    %c0_98 = arith.constant 0 : index
    %170 = vector.load %arg12[%c0_97, %c0_98] : memref<32x24xf32, #tpu.memory_space<vmem>>, vector<32x24xf32>
    %171 = arith.truncf %169 : vector<64x32xf32> to vector<64x32xbf16>
    %172 = arith.truncf %170 : vector<32x24xf32> to vector<32x24xbf16>
    %cst_99 = arith.constant dense<0.000000e+00> : vector<64x24xf32>
    %173 = tpu.matmul %171, %172, %cst_99 {dimension_numbers = #tpu.dot_dimension_numbers<[1], [0], [0], [1], [0, 0, 1, 1], [], []>} : vector<64x32xbf16>, vector<32x24xbf16>, vector<64x24xf32> -> vector<64x24xf32>
    %c0_100 = arith.constant 0 : index
    %c0_101 = arith.constant 0 : index
    %174 = vector.load %arg13[%c0_100, %c0_101] : memref<1x24xf32, #tpu.memory_space<vmem>>, vector<1x24xf32>
    %175 = vector.broadcast %174 : vector<1x24xf32> to vector<64x24xf32>
    %176 = arith.addf %173, %175 : vector<64x24xf32>
    %c0_102 = arith.constant 0 : index
    %c0_103 = arith.constant 0 : index
    %177 = vector.load %arg14[%c0_102, %c0_103] : memref<24x64xf32, #tpu.memory_space<vmem>>, vector<24x64xf32>
    %178 = arith.truncf %176 : vector<64x24xf32> to vector<64x24xbf16>
    %179 = arith.truncf %177 : vector<24x64xf32> to vector<24x64xbf16>
    %cst_104 = arith.constant dense<0.000000e+00> : vector<64x64xf32>
    %180 = tpu.matmul %178, %179, %cst_104 {dimension_numbers = #tpu.dot_dimension_numbers<[1], [0], [0], [1], [0, 0, 1, 1], [], []>} : vector<64x24xbf16>, vector<24x64xbf16>, vector<64x64xf32> -> vector<64x64xf32>
    %c0_105 = arith.constant 0 : index
    %c0_106 = arith.constant 0 : index
    %181 = vector.load %arg15[%c0_105, %c0_106] : memref<1x64xf32, #tpu.memory_space<vmem>>, vector<1x64xf32>
    %182 = vector.broadcast %181 : vector<1x64xf32> to vector<64x64xf32>
    %183 = arith.addf %180, %182 : vector<64x64xf32>
    %184 = arith.negf %183 : vector<64x64xf32>
    %185 = math.exp %184 : vector<64x64xf32>
    %cst_107 = arith.constant 1.000000e+00 : f32
    %186 = vector.broadcast %cst_107 : f32 to vector<64x64xf32>
    %187 = arith.addf %186, %185 : vector<64x64xf32>
    %188 = arith.divf %186, %187 : vector<64x64xf32>
    %189 = arith.mulf %183, %188 : vector<64x64xf32>
    %190 = arith.negf %189 : vector<64x64xf32>
    %191 = math.exp %190 : vector<64x64xf32>
    %cst_108 = arith.constant 1.000000e+00 : f32
    %192 = vector.broadcast %cst_108 : f32 to vector<64x64xf32>
    %193 = arith.addf %192, %191 : vector<64x64xf32>
    %194 = arith.divf %192, %193 : vector<64x64xf32>
    %195 = arith.mulf %189, %194 : vector<64x64xf32>
    %196 = vector.shape_cast %195 : vector<64x64xf32> to vector<1x64x64xf32>
    %cst_109 = arith.constant dense<0.000000e+00> : vector<1x64xf32>
    %197 = vector.multi_reduction <add>, %196, %cst_109 [1] : vector<1x64x64xf32> to vector<1x64xf32>
    %cst_110 = arith.constant 1.562500e-02 : f32
    %198 = vector.broadcast %cst_110 : f32 to vector<1x64xf32>
    %199 = arith.mulf %197, %198 : vector<1x64xf32>
    %c0_111 = arith.constant 0 : index
    %c0_112 = arith.constant 0 : index
    %200 = vector.load %arg16[%c0_111, %c0_112] : memref<64x128xf32, #tpu.memory_space<vmem>>, vector<64x128xf32>
    %201 = arith.truncf %199 : vector<1x64xf32> to vector<1x64xbf16>
    %202 = arith.truncf %200 : vector<64x128xf32> to vector<64x128xbf16>
    %cst_113 = arith.constant dense<0.000000e+00> : vector<1x128xf32>
    %203 = tpu.matmul %201, %202, %cst_113 {dimension_numbers = #tpu.dot_dimension_numbers<[1], [0], [0], [1], [0, 0, 1, 1], [], []>} : vector<1x64xbf16>, vector<64x128xbf16>, vector<1x128xf32> -> vector<1x128xf32>
    %c0_114 = arith.constant 0 : index
    %c0_115 = arith.constant 0 : index
    %204 = vector.load %arg17[%c0_114, %c0_115] : memref<1x128xf32, #tpu.memory_space<vmem>>, vector<1x128xf32>
    %205 = arith.addf %203, %204 : vector<1x128xf32>
    %c0_116 = arith.constant 0 : index
    %c0_117 = arith.constant 0 : index
    %206 = vector.load %arg18[%c0_116, %c0_117] : memref<128x2xf32, #tpu.memory_space<vmem>>, vector<128x2xf32>
    %207 = arith.truncf %205 : vector<1x128xf32> to vector<1x128xbf16>
    %208 = arith.truncf %206 : vector<128x2xf32> to vector<128x2xbf16>
    %cst_118 = arith.constant dense<0.000000e+00> : vector<1x2xf32>
    %209 = tpu.matmul %207, %208, %cst_118 {dimension_numbers = #tpu.dot_dimension_numbers<[1], [0], [0], [1], [0, 0, 1, 1], [], []>} : vector<1x128xbf16>, vector<128x2xbf16>, vector<1x2xf32> -> vector<1x2xf32>
    %c0_119 = arith.constant 0 : index
    %c0_120 = arith.constant 0 : index
    %210 = vector.load %arg19[%c0_119, %c0_120] : memref<1x2xf32, #tpu.memory_space<vmem>>, vector<1x2xf32>
    %211 = arith.addf %209, %210 : vector<1x2xf32>
    %cst_121 = arith.constant dense<0xFF800000> : vector<1xf32>
    %212 = vector.multi_reduction <maximumf>, %211, %cst_121 [1] : vector<1x2xf32> to vector<1xf32>
    %213 = vector.shape_cast %212 : vector<1xf32> to vector<1x1xf32>
    %214 = vector.broadcast %213 : vector<1x1xf32> to vector<1x2xf32>
    %215 = arith.subf %211, %214 : vector<1x2xf32>
    %216 = math.exp %215 : vector<1x2xf32>
    %cst_122 = arith.constant dense<0.000000e+00> : vector<1xf32>
    %217 = vector.multi_reduction <add>, %216, %cst_122 [1] : vector<1x2xf32> to vector<1xf32>
    %218 = vector.shape_cast %217 : vector<1xf32> to vector<1x1xf32>
    %219 = vector.broadcast %218 : vector<1x1xf32> to vector<1x2xf32>
    %220 = arith.divf %216, %219 : vector<1x2xf32>
    %221 = vector.shape_cast %220 : vector<1x2xf32> to vector<1x1x2xf32>
    %c0_123 = arith.constant 0 : index
    %c0_124 = arith.constant 0 : index
    %c0_125 = arith.constant 0 : index
    %222 = vector.load %arg20[%c0_123, %c0_124, %c0_125] : memref<1x1x2xf32, #tpu.memory_space<vmem>>, vector<1x1x2xf32>
    tpu.vector_store %arg20[%c0_123, %c0_124, %c0_125], %221 {strides = array<i32>} : memref<1x1x2xf32, #tpu.memory_space<vmem>>, vector<1x1x2xf32>,
    return
  }
  func.func @transform_0(%arg0: i32) -> (i32, i32, i32, i32, i32, i32) {
    %c0_i32 = arith.constant 0 : i32
    %c0_i32_0 = arith.constant 0 : i32
    %c0_i32_1 = arith.constant 0 : i32
    %c0_i32_2 = arith.constant 0 : i32
    %c0_i32_3 = arith.constant 0 : i32
    %c0_i32_4 = arith.constant 0 : i32
    return %arg0, %c0_i32, %c0_i32_0, %c0_i32_1, %c0_i32_2, %c0_i32_3 : i32, i32, i32, i32, i32, i32
  }
  func.func @transform_1(%arg0: i32) -> (i32, i32) {
    %c0_i32 = arith.constant 0 : i32
    %c0_i32_0 = arith.constant 0 : i32
    %c0_i32_1 = arith.constant 0 : i32
    return %c0_i32, %c0_i32_0 : i32, i32
  }
  func.func @transform_2(%arg0: i32) -> (i32, i32) {
    %c0_i32 = arith.constant 0 : i32
    %c0_i32_0 = arith.constant 0 : i32
    %c0_i32_1 = arith.constant 0 : i32
    return %c0_i32, %c0_i32_0 : i32, i32
  }
  func.func @transform_3(%arg0: i32) -> (i32, i32) {
    %c0_i32 = arith.constant 0 : i32
    %c0_i32_0 = arith.constant 0 : i32
    %c0_i32_1 = arith.constant 0 : i32
    return %c0_i32, %c0_i32_0 : i32, i32
  }
  func.func @transform_4(%arg0: i32) -> (i32, i32) {
    %c0_i32 = arith.constant 0 : i32
    %c0_i32_0 = arith.constant 0 : i32
    %c0_i32_1 = arith.constant 0 : i32
    return %c0_i32, %c0_i32_0 : i32, i32
  }
  func.func @transform_5(%arg0: i32) -> (i32, i32) {
    %c0_i32 = arith.constant 0 : i32
    %c0_i32_0 = arith.constant 0 : i32
    %c0_i32_1 = arith.constant 0 : i32
    return %c0_i32, %c0_i32_0 : i32, i32
  }
  func.func @transform_6(%arg0: i32) -> (i32, i32) {
    %c0_i32 = arith.constant 0 : i32
    %c0_i32_0 = arith.constant 0 : i32
    %c0_i32_1 = arith.constant 0 : i32
    return %c0_i32, %c0_i32_0 : i32, i32
  }
  func.func @transform_7(%arg0: i32) -> (i32, i32) {
    %c0_i32 = arith.constant 0 : i32
    %c0_i32_0 = arith.constant 0 : i32
    %c0_i32_1 = arith.constant 0 : i32
    return %c0_i32, %c0_i32_0 : i32, i32
  }
  func.func @transform_8(%arg0: i32) -> (i32, i32) {
    %c0_i32 = arith.constant 0 : i32
    %c0_i32_0 = arith.constant 0 : i32
    %c0_i32_1 = arith.constant 0 : i32
    return %c0_i32, %c0_i32_0 : i32, i32
  }
  func.func @transform_9(%arg0: i32) -> (i32, i32) {
    %c0_i32 = arith.constant 0 : i32
    %c0_i32_0 = arith.constant 0 : i32
    %c0_i32_1 = arith.constant 0 : i32
    return %c0_i32, %c0_i32_0 : i32, i32
  }
  func.func @transform_10(%arg0: i32) -> (i32, i32) {
    %c0_i32 = arith.constant 0 : i32
    %c0_i32_0 = arith.constant 0 : i32
    %c0_i32_1 = arith.constant 0 : i32
    return %c0_i32, %c0_i32_0 : i32, i32
  }
  func.func @transform_11(%arg0: i32) -> (i32, i32) {
    %c0_i32 = arith.constant 0 : i32
    %c0_i32_0 = arith.constant 0 : i32
    %c0_i32_1 = arith.constant 0 : i32
    return %c0_i32, %c0_i32_0 : i32, i32
  }
  func.func @transform_12(%arg0: i32) -> (i32, i32) {
    %c0_i32 = arith.constant 0 : i32
    %c0_i32_0 = arith.constant 0 : i32
    %c0_i32_1 = arith.constant 0 : i32
    return %c0_i32, %c0_i32_0 : i32, i32
  }
  func.func @transform_13(%arg0: i32) -> (i32, i32) {
    %c0_i32 = arith.constant 0 : i32
    %c0_i32_0 = arith.constant 0 : i32
    %c0_i32_1 = arith.constant 0 : i32
    return %c0_i32, %c0_i32_0 : i32, i32
  }
  func.func @transform_14(%arg0: i32) -> (i32, i32) {
    %c0_i32 = arith.constant 0 : i32
    %c0_i32_0 = arith.constant 0 : i32
    %c0_i32_1 = arith.constant 0 : i32
    return %c0_i32, %c0_i32_0 : i32, i32
  }
  func.func @transform_15(%arg0: i32) -> (i32, i32) {
    %c0_i32 = arith.constant 0 : i32
    %c0_i32_0 = arith.constant 0 : i32
    %c0_i32_1 = arith.constant 0 : i32
    return %c0_i32, %c0_i32_0 : i32, i32
  }
  func.func @transform_16(%arg0: i32) -> (i32, i32) {
    %c0_i32 = arith.constant 0 : i32
    %c0_i32_0 = arith.constant 0 : i32
    %c0_i32_1 = arith.constant 0 : i32
    return %c0_i32, %c0_i32_0 : i32, i32
  }
  func.func @transform_17(%arg0: i32) -> (i32, i32) {
    %c0_i32 = arith.constant 0 : i32
    %c0_i32_0 = arith.constant 0 : i32
    %c0_i32_1 = arith.constant 0 : i32
    return %c0_i32, %c0_i32_0 : i32, i32
  }
  func.func @transform_18(%arg0: i32) -> (i32, i32) {
    %c0_i32 = arith.constant 0 : i32
    %c0_i32_0 = arith.constant 0 : i32
    %c0_i32_1 = arith.constant 0 : i32
    return %c0_i32, %c0_i32_0 : i32, i32
  }
  func.func @transform_19(%arg0: i32) -> (i32, i32, i32) {
    %c0_i32 = arith.constant 0 : i32
    %c0_i32_0 = arith.constant 0 : i32
    %c0_i32_1 = arith.constant 0 : i32
    return %arg0, %c0_i32, %c0_i32_0 : i32, i32, i32
  }
}

</mosaic_0001>

<bundles_post_ra>
// kernel: my_efficientnet_b0_forward.1
= control target key start
LH: loop header
LB: loop body
LE: loop exit
PB: predicated region body
PF: predicated region fallthrough
CT: control target
= control target key end

     0   :  { %s4619_s0 = inlined_call_operand.vmem [shape: f32[2,2,2,3,9,9], index: 0, kind: input, shape index: {}]   ;;  %s4620_s1 = inlined_call_operand.vmem [shape: f32[27,16], index: 1, kind: input, shape index: {}]   ;;  %s4621_s2 = inlined_call_operand.vmem [shape: f32[1,16], index: 2, kind: input, shape index: {}]   ;;  %s4622_s3 = inlined_call_operand.vmem [shape: f32[16,32], index: 3, kind: input, shape index: {}]   ;;  %s4623_s4 = inlined_call_operand.vmem [shape: f32[1,32], index: 4, kind: input, shape index: {}]   ;;  %s4624_s5 = inlined_call_operand.vmem [shape: f32[9,32], index: 5, kind: input, shape index: {}]   ;;  %s4625_s6 = inlined_call_operand.vmem [shape: f32[1,32], index: 6, kind: input, shape index: {}]   ;;  %s4626_s7 = inlined_call_operand.vmem [shape: f32[32,8], index: 7, kind: input, shape index: {}]   ;;  %s4627_s8 = inlined_call_operand.vmem [shape: f32[1,8], index: 8, kind: input, shape index: {}]   ;;  %s4628_s9 = inlined_call_operand.vmem [shape: f32[8,32], index: 9, kind: input, shape index: {}]   ;;  %s4629_s10 = inlined_call_operand.vmem [shape: f32[1,32], index: 10, kind: input, shape index: {}]   ;;  %s4630_s11 = inlined_call_operand.vmem [shape: f32[32,24], index: 11, kind: input, shape index: {}]   ;;  %s4631_s12 = inlined_call_operand.vmem [shape: f32[1,24], index: 12, kind: input, shape index: {}]   ;;  %s4632_s13 = inlined_call_operand.vmem [shape: f32[24,64], index: 13, kind: input, shape index: {}]   ;;  %s4633_s14 = inlined_call_operand.vmem [shape: f32[1,64], index: 14, kind: input, shape index: {}]   ;;  %s4634_s15 = inlined_call_operand.vmem [shape: f32[64,128], index: 15, kind: input, shape index: {}]   ;;  %s4635_s16 = inlined_call_operand.vmem [shape: f32[1,128], index: 16, kind: input, shape index: {}]   ;;  %s4636_s17 = inlined_call_operand.vmem [shape: f32[128,2], index: 17, kind: input, shape index: {}]   ;;  %s4637_s18 = inlined_call_operand.vmem [shape: f32[1,2], index: 18, kind: input, shape index: {}]   ;;  %s4638_s19 = inlined_call_operand.hbm [shape: f32[2,1,2], index: 19, kind: output, shape index: {}]  }
   0x1   :  { %4644 = sst [smem:[#allocation8_spill]] %s4619_s0 }
   0x2   :  { %4645 = sst [smem:[#allocation9_spill]] %s4620_s1 }
   0x3   :  { %4646 = sst [smem:[#allocation10_spill]] %s4621_s2 }
   0x4   :  { %4647 = sst [smem:[#allocation11_spill]] %s4622_s3 }
   0x5   :  { %4648 = sst [smem:[#allocation12_spill]] %s4623_s4 }
   0x6   :  { %4649 = sst [smem:[#allocation13_spill]] %s4624_s5 }
   0x7   :  { %4650 = sst [smem:[#allocation14_spill]] %s4625_s6 }
   0x8   :  { %24 = vsyncpa [#allocation4], 0 }
   0x9   :  { %26 = vsyncpa [#allocation4 + $0x1], 0  ;;  %s3365_s0 = smov 0   ;;  %s3367_s30 = smov 0  }
   0xa   :  { %s3369_s20 = smov 0   ;;  %s3371_s21 = smov 0  }
   0xb LB: > { %4651 = sst [smem:[#allocation6_spill]] %s3254_s20  ;;  %s3386_s1 = sadd.s32 4294967295, %s3258_s21   ;;  %s3258_s21 = sphi %s3371_s21, %s4732_s21   ;;  %s3254_s20 = sphi %s3369_s20, %s4729_s20   ;;  %s3250_s30 = sphi %s3367_s30, %s4731_s30   ;;  %s3246_s0 = sphi %s3365_s0, %s4730_s0  }
   0xc   : > { %s2682_s22 = sadd.s32 4294967294, %s3258_s21   ;;  %s3390_s2 = sadd.s32 1, %s3258_s21  }
   0xd   : > { %s443_s23 = sadd.s32 1, %s3254_s20  ;;  %s440_s24 = ssub.s32 %s3258_s21, %s3390_s2 }
   0xe   : > { %p453_p0 = scmp.ne.s32.totalorder %s3254_s20, %s3250_s30  ;;  %p441_p1 = scmp.eq.s32.totalorder %s440_s24, 0 }
   0xf   : > { %p454_p2 = scmp.eq.s32.totalorder %s3386_s1, 1  ;;  %p459_p3 = scmp.ne.s32.totalorder %s3250_s30, %s3246_s0 }
  0x10   : > { %p460_p4 = scmp.eq.s32.totalorder %s2682_s22, 1  ;;  %p2685_p7 = scmp.ge.s32.totalorder %s3258_s21, 1 }
  0x11   : > { %s3401_s25 = scalar_select %p441_p1, %s3254_s20, %s443_s23  }
  0x12   : > { %p3403_p5 = por %p454_p2, %p453_p0  ;;  %p3407_p6 = por %p460_p4, %p459_p3 }
  0x13   : > { %4652 = sst [smem:[#allocation7_spill]] %s3401_s25  ;;  %p540_p8 = scmp.lt.s32.totalorder %s3258_s21, 3 }
  0x15   : > { %p541_p9 = pnand %p2685_p7, %p540_p8 }
  0x16   : > { %p595_p10 = scmp.lt.s32.totalorder (!%p541_p9), %s3386_s1, 1  ;;  %s4655_s23 = sld [smem:[#allocation8_spill]] (!%p541_p9)  ;;  %vm643_vm0 = vcmask (!%p541_p9), 1046528   ;;  %vm678_vm1 = vcmask (!%p541_p9), 1041409   ;;  %vm681_vm2 = vcmask (!%p541_p9), 1042434   ;;  %vm684_vm3 = vcmask (!%p541_p9), 1043459  }
  0x17   : > { %544 = sbr.rel (%p541_p9) target bundleno = 2699 (0xa8b), region = 96  ;;  %vm687_vm4 = vcmask (!%p541_p9), 1044484   ;;  %vm690_vm5 = vcmask (!%p541_p9), 1045509   ;;  %s4656_s22 = sld [smem:[#allocation9_spill]] (!%p541_p9)  ;;  %vm693_vm6 = vcmask (!%p541_p9), 1046534   ;;  %vm696_vm7 = vcmask (!%p541_p9), 1047559  }
  0x18   : > { %vm1369_vm8 = vcmask (!%p541_p9), 1044480   ;;  %vm1370_vm9 = vcmask (!%p541_p9), 1045504   ;;  %vm1356_vm10 = vcmask (!%p541_p9), 220160   ;;  %s4724_s20 = sld [smem:[#allocation10_spill]] (!%p541_p9)  ;;  %vm1511_vm11 = vcmask (!%p541_p9), 130048   ;;  %s4725_s4 = sld [smem:[#allocation12_spill]] (!%p541_p9) }
  0x19   : > { %vm1645_vm12 = vcmask (!%p541_p9), 261120   ;;  %vm1647_vm13 = vcmask (!%p541_p9), 254976   ;;  %vm3263_vm14 = vmmov (!%p541_p9), 0   ;;  %s4726_s5 = sld [smem:[#allocation13_spill]] (!%p541_p9)  ;;  %s4727_s6 = sld [smem:[#allocation14_spill]] (!%p541_p9)  ;;  %vm2090_vm15 = vcmask (!%p541_p9), 1043456  }
  0x1e   : > { %s596_s27 = scalar_select %p595_p10, %s3386_s1, 1 }
  0x20   : > { %s2908_s28 = smul.u32 192, %s596_s27  ;;  %s3260_s27 = smov 127  }
  0x22   : > { %s3418_s24 = scalar_lea.vmem %s4655_s23, %s2908_s28  ;;  %s4723_s28 = sld [smem:[#allocation11_spill]] }
  0x23   : > { %v3421_v0 = vld [vmem:[%s3418_s24 + $0x20] sm:$0xff]  ;;  %v3424_v1 = vld [vmem:[%s3418_s24 + $0x70] sm:$0xff]  ;;  %v602_v10 = vld [vmem:[%s3418_s24 + $0x8] sm:$0x1] }
  0x24   : > { %v3427_v2 = vld [vmem:[%s3418_s24 + $0x10] sm:$0xff]  ;;  %v2952_v3 = vpack.i.bf16 %v3424_v1, %v3421_v0  ;;  %v3432_v4 = vld [vmem:[%s3418_s24 + $0x60] sm:$0xff]  ;;  %v650_v8 = vrot.slane %v3421_v0, 1  ;;  %v604_v11 = vld [vmem:[%s3418_s24 + $0x18] sm:$0x1]  ;;  %v645_v15 = vrot.slane %v602_v10, 1 }
  0x25   : > { %v3435_v5 = vld [vmem:[%s3418_s24] sm:$0xff]  ;;  %v647_v7 = vrot.slane %v3427_v2, 1  ;;  %v2962_v9 = vpack.i.bf16 %v3432_v4, %v3427_v2  ;;  %v929_v13 = vrot.slane %v3427_v2, 2  ;;  %v648_v16 = vrot.slane %v604_v11, 1  ;;  %v606_v17 = vld [vmem:[%s3418_s24 + $0x28] sm:$0x1] }
  0x26   : > { %v3438_v6 = vld [vmem:[%s3418_s24 + $0x80] sm:$0xff]  ;;  %v644_v12 = vrot.slane %v3435_v5, 1  ;;  %2953 = vrot.lane.b32.xlu0 %v2952_v3, %s3260_s27  ;;  %v3453_v18 = vld [vmem:[%s3418_s24 + $0x30] sm:$0xff]  ;;  %v651_v20 = vrot.slane %v606_v17, 1  ;;  %v847_v22 = vrot.slane %v3435_v5, 2  ;;  %v928_v28 = vrot.slane %v3435_v5, 3 }
  0x27   : > { %v2957_v14 = vpack.i.bf16 %v3435_v5, %v3438_v6  ;;  %v3456_v19 = vld [vmem:[%s3418_s24 + $0x40] sm:$0xff]  ;;  %2963 = vrot.lane.b32.xlu1 %v2962_v9, %s3260_s27  ;;  %v3460_v21 = vld [vmem:[%s3418_s24 + $0x50] sm:$0xff]  ;;  %v850_v23 = vrot.slane %v3453_v18, 7  ;;  %v3469_v26 = vsel %vm643_vm0, %v647_v7, %v648_v16  ;;  %v677_v36 = vrot.slane %v3427_v2, 7  ;;  %v2688_v62 = vld [vmem:[%s3418_s24 + $0x38] sm:$0x1] }
  0x28   : > { %v852_v24 = vrot.slane %v3456_v19, 6  ;;  %v3466_v25 = vsel %vm643_vm0, %v644_v12, %v645_v15  ;;  %v854_v27 = vrot.slane %v3460_v21, 5  ;;  %v3476_v30 = vsel %vm643_vm0, %v650_v8, %v651_v20  ;;  %v2690_v63 = vld [vmem:[%s3418_s24 + $0x48] sm:$0x1]  ;;  %v2692_v3 = vld [vmem:[%s3418_s24 + $0x58] sm:$0x1] }
  0x29   : > { %v2967_v29 = vpack.i.bf16 %v3469_v26, %v3466_v25  ;;  %v848_v31 = vsel %vm678_vm1, %v647_v7, %v847_v22  ;;  %v933_v32 = vrot.slane %v3456_v19, 7  ;;  %v930_v34 = vsel %vm678_vm1, %v929_v13, %v928_v28 }
  0x2a   : > { %2958 = vrot.lane.b32.xlu0 %v2957_v14, %s3260_s27  ;;  %v849_v33 = vsel %vm681_vm2, %v3421_v0, %v848_v31  ;;  %v935_v35 = vrot.slane %v3460_v21, 6  ;;  %v931_v38 = vsel %vm681_vm2, %v650_v8, %v930_v34  ;;  %v680_v39 = vrot.slane %v3421_v0, 6 }
  0x2b   : > { %2968 = vrot.lane.b32.xlu1 %v2967_v29, %s3260_s27  ;;  %v851_v37 = vsel %vm684_vm3, %v850_v23, %v849_v33  ;;  %v683_v40 = vrot.slane %v3453_v18, 5  ;;  %v932_v42 = vsel %vm684_vm3, %v3453_v18, %v931_v38  ;;  %v679_v43 = vsel %vm678_vm1, %v677_v36, %v3435_v5 }
  0x2c   : > { %v853_v41 = vsel %vm687_vm4, %v852_v24, %v851_v37  ;;  %v686_v44 = vrot.slane %v3456_v19, 4  ;;  %v934_v46 = vsel %vm687_vm4, %v933_v32, %v932_v42  ;;  %v682_v47 = vsel %vm681_vm2, %v680_v39, %v679_v43 }
  0x2d   : > { %v3498_v45 = vsel %vm690_vm5, %v854_v27, %v853_v41  ;;  %v689_v48 = vrot.slane %v3460_v21, 3  ;;  %v3506_v49 = vsel %vm690_vm5, %v935_v35, %v934_v46  ;;  %v685_v50 = vsel %vm684_vm3, %v683_v40, %v682_v47 }
  0x2e   : > { %672 = vrot.lane.b32.xlu0 %v3476_v30, %s3260_s27  ;;  %v766_v51 = vsel %vm678_vm1, %v3427_v2, %v644_v12  ;;  %v767_v52 = vrot.slane %v3421_v0, 7  ;;  %v688_v53 = vsel %vm687_vm4, %v686_v44, %v685_v50  ;;  %v769_v54 = vrot.slane %v3453_v18, 6 }
  0x2f   : > { %v771_v55 = vrot.slane %v3456_v19, 5  ;;  %v773_v56 = vrot.slane %v3460_v21, 4  ;;  %v3517_v57 = vsel %vm690_vm5, %v689_v48, %v688_v53  ;;  %v659_v7 = vrot.slane %v3453_v18, 1 }
  0x30   : > { %v768_v58 = vsel %vm681_vm2, %v767_v52, %v766_v51  ;;  %v660_v8 = vrot.slane %v2688_v62, 1  ;;  %v662_v9 = vrot.slane %v3456_v19, 1  ;;  %v663_v10 = vrot.slane %v2690_v63, 1  ;;  %v1340_v62 = vld [vmem:[%s4656_s22 + $0x8] sm:$0xff]  ;;  %v3599_v63 = vld [vmem:[%s3418_s24 + $0xa0] sm:$0xff] }
  0x31   : > { %v770_v59 = vsel %vm684_vm3, %v769_v54, %v768_v58  ;;  %v665_v11 = vrot.slane %v3460_v21, 1  ;;  %v666_v12 = vrot.slane %v2692_v3, 1  ;;  %v1010_v16 = vrot.slane %v3435_v5, 4  ;;  %v3602_v3 = vld [vmem:[%s3418_s24 + $0xb0] sm:$0xff] }
  0x32   : > { %v772_v60 = vsel %vm687_vm4, %v771_v55, %v770_v59  ;;  %v3532_v13 = vsel %vm643_vm0, %v659_v7, %v660_v8  ;;  %v3535_v14 = vsel %vm643_vm0, %v662_v9, %v663_v10  ;;  %v1011_v17 = vrot.slane %v3427_v2, 3 }
  0x33   : > { %v3523_v61 = vsel %vm690_vm5, %v773_v56, %v772_v60  ;;  %v3538_v15 = vsel %vm643_vm0, %v665_v11, %v666_v12  ;;  %v1013_v20 = vrot.slane %v3421_v0, 2  ;;  %v1017_v22 = vrot.slane %v3460_v21, 7  ;;  %v1339_v60 = vld [vmem:[%s4656_s22] sm:$0xff] }
  0x34   : > { %v1092_v23 = vrot.slane %v3435_v5, 5  ;;  %v1093_v24 = vrot.slane %v3427_v2, 4  ;;  %v1095_v27 = vrot.slane %v3421_v0, 3  ;;  %v1012_v28 = vsel %vm678_vm1, %v1011_v17, %v1010_v16 }
  0x35   : > { %v1097_v29 = vrot.slane %v3453_v18, 2  ;;  %v1174_v31 = vrot.slane %v3435_v5, 6  ;;  %v1175_v32 = vrot.slane %v3427_v2, 5  ;;  %v1014_v33 = vsel %vm681_vm2, %v1013_v20, %v1012_v28 }
  0x36   : > { %v1094_v34 = vsel %vm678_vm1, %v1093_v24, %v1092_v23  ;;  %v1177_v35 = vrot.slane %v3421_v0, 4  ;;  %v1179_v36 = vrot.slane %v3453_v18, 3  ;;  %v1015_v37 = vsel %vm684_vm3, %v659_v7, %v1014_v33 }
  0x37   : > { %v1096_v38 = vsel %vm681_vm2, %v1095_v27, %v1094_v34  ;;  %v1176_v39 = vsel %vm678_vm1, %v1175_v32, %v1174_v31  ;;  %v1181_v40 = vrot.slane %v3456_v19, 2  ;;  %v1016_v41 = vsel %vm687_vm4, %v3456_v19, %v1015_v37 }
  0x38   : > { %v1098_v42 = vsel %vm684_vm3, %v1097_v29, %v1096_v38  ;;  %v1178_v43 = vsel %vm681_vm2, %v1177_v35, %v1176_v39  ;;  %v1256_v44 = vrot.slane %v3435_v5, 7  ;;  %v3565_v46 = vsel %vm690_vm5, %v1017_v22, %v1016_v41 }
  0x39   : > { %v1099_v47 = vsel %vm687_vm4, %v662_v9, %v1098_v42  ;;  %v1180_v48 = vsel %vm684_vm3, %v1179_v36, %v1178_v43  ;;  %v1257_v50 = vrot.slane %v3427_v2, 6  ;;  %v1259_v53 = vrot.slane %v3421_v0, 5 }
  0x3a   : > { %v3572_v51 = vsel %vm690_vm5, %v3460_v21, %v1099_v47  ;;  %v1182_v52 = vsel %vm687_vm4, %v1181_v40, %v1180_v48  ;;  %v1261_v54 = vrot.slane %v3453_v18, 4  ;;  %v1263_v2 = vrot.slane %v3456_v19, 3 }
  0x3b   : > { %v3578_v5 = vsel %vm690_vm5, %v665_v11, %v1182_v52  ;;  %v1258_v55 = vsel %vm678_vm1, %v1257_v50, %v1256_v44  ;;  %v1265_v56 = vrot.slane %v3460_v21, 2  ;;  %v1347_v19 = vpack.c.bf16 %v1340_v62, %v1339_v60  ;;  %v3596_v21 = vld [vmem:[%s3418_s24 + $0x90] sm:$0xff] }
  0x3c   : > { %v1260_v58 = vsel %vm681_vm2, %v1259_v53, %v1258_v55  ;;  %v861_v7 = vrot.slane %v3432_v4, 1  ;;  %v864_v8 = vrot.slane %v3438_v6, 7  ;;  %v866_v9 = vrot.slane %v3596_v21, 6 }
  0x3d   : > { %v1262_v59 = vsel %vm684_vm3, %v1261_v54, %v1260_v58  ;;  %2811 = vmatprep.subr.bf16.mxu0 %v1347_v19  ;;  %2903 = vmatprep.subr.bf16.mxu1 %v1347_v19  ;;  %v868_v10 = vrot.slane %v3599_v63, 5  ;;  %v870_v11 = vrot.slane %v3602_v3, 4  ;;  %v942_v12 = vrot.slane %v3432_v4, 2 }
  0x3e   : > { %v1264_v0 = vsel %vm687_vm4, %v1263_v2, %v1262_v59  ;;  %2812 = vmatpush3.bf16.msra.mxu0 %v1347_v19  ;;  %2905 = vmatpush3.bf16.msra.mxu1 %v1347_v19  ;;  %v944_v16 = vrot.slane %v3424_v1, 1  ;;  %v947_v17 = vrot.slane %v3596_v21, 7  ;;  %v949_v20 = vrot.slane %v3599_v63, 6 }
  0x3f   : > { %v3587_v18 = vsel %vm690_vm5, %v1265_v56, %v1264_v0  ;;  %v951_v22 = vrot.slane %v3602_v3, 5  ;;  %v698_v23 = vrot.slane %v3432_v4, 7  ;;  %v700_v24 = vrot.slane %v3424_v1, 6 }
  0x40   : > { %v702_v27 = vrot.slane %v3438_v6, 5  ;;  %v704_v28 = vrot.slane %v3596_v21, 4  ;;  %v706_v29 = vrot.slane %v3599_v63, 3  ;;  %v708_v31 = vrot.slane %v3602_v3, 2 }
  0x41   : > { %v781_v32 = vrot.slane %v3424_v1, 7  ;;  %v783_v33 = vrot.slane %v3438_v6, 6  ;;  %vm2086_vm0 = vcmask 64512  }
  0x98   : > { %v2954_v42 = vpop.permute.xlu0 %2953 }
  0x99   : > { %v3684_v59 = vunpack.i.l.bf16 %v2954_v42  ;;  %v2964_v60 = vpop.permute.xlu1 %2963  ;;  %v3689_v48 = vunpack.i.h.bf16 %v2954_v42 }
  0x9a   : > { %v3691_v56 = vunpack.i.h.bf16 %v2964_v60  ;;  %v3693_v47 = vunpack.i.l.bf16 %v2964_v60 }
  0x9b   : > { %v860_v58 = vrot.slane %v3684_v59, 2  ;;  %v941_v0 = vrot.slane %v3684_v59, 3  ;;  %v699_v19 = vsel %vm678_vm1, %v698_v23, %v3684_v59  ;;  %v779_v62 = vrot.slane %v3684_v59, 1 }
  0x9c   : > { %v2959_v55 = vpop.permute.xlu0 %2958  ;;  %v858_v42 = vrot.slane %v3693_v47, 3  ;;  %v939_v54 = vrot.slane %v3693_v47, 4  ;;  %v695_v60 = vrot.slane %v3693_v47, 1  ;;  %v777_v2 = vrot.slane %v3693_v47, 2 }
  0x9d   : > { %v3707_v44 = vunpack.i.h.bf16 %v2959_v55  ;;  %v3709_v41 = vunpack.i.l.bf16 %v2959_v55  ;;  %v2969_v53 = vpop.permute.xlu1 %2968  ;;  %v862_v23 = vsel %vm678_vm1, %v861_v7, %v860_v58  ;;  %v872_v43 = vrot.slane %v3691_v56, 3 }
  0x9e   : > { %v3715_v40 = vunpack.i.h.bf16 %v2969_v53  ;;  %v3717_v52 = vunpack.i.l.bf16 %v2969_v53  ;;  %v863_v38 = vsel %vm681_vm2, %v3424_v1, %v862_v23  ;;  %v943_v50 = vsel %vm678_vm1, %v942_v12, %v941_v0 }
  0x9f   : > { %v856_v55 = vrot.slane %v3707_v44, 4  ;;  %v937_v39 = vrot.slane %v3707_v44, 5  ;;  %v692_v37 = vrot.slane %v3707_v44, 2  ;;  %v775_v7 = vrot.slane %v3707_v44, 3 }
  0xa0   : > { %v865_v53 = vsel %vm684_vm3, %v864_v8, %v863_v38  ;;  %v945_v58 = vsel %vm681_vm2, %v944_v16, %v943_v50  ;;  %v953_v23 = vrot.slane %v3691_v56, 4  ;;  %v701_v12 = vsel %vm681_vm2, %v700_v24, %v699_v19 }
  0xa1   : > { %v857_v0 = vsel %vm693_vm6, %v856_v55, %v3498_v45  ;;  %v938_v36 = vsel %vm693_vm6, %v937_v39, %v3506_v49  ;;  %v694_v35 = vsel %vm693_vm6, %v692_v37, %v3517_v57  ;;  %v776_v8 = vsel %vm693_vm6, %v775_v7, %v3523_v61 }
  0xa2   : > { %v859_v16 = vsel %vm696_vm7, %v858_v42, %v857_v0  ;;  %v940_v38 = vsel %vm696_vm7, %v939_v54, %v938_v36  ;;  %v697_v50 = vsel %vm696_vm7, %v695_v60, %v694_v35  ;;  %v778_v24 = vsel %vm696_vm7, %v777_v2, %v776_v8 }
  0xa3   : > { %v2985_v19 = vpack.i.bf16 %v940_v38, %v859_v16  ;;  %v2972_v34 = vpack.i.bf16 %v778_v24, %v697_v50  ;;  %v867_v45 = vsel %vm687_vm4, %v866_v9, %v865_v53  ;;  %v946_v49 = vsel %vm684_vm3, %v3438_v6, %v945_v58 }
  0xa4   : > { %v869_v57 = vsel %vm690_vm5, %v868_v10, %v867_v45  ;;  %v948_v61 = vsel %vm687_vm4, %v947_v17, %v946_v49  ;;  %v703_v35 = vsel %vm684_vm3, %v702_v27, %v701_v12  ;;  %v710_v36 = vrot.slane %v3691_v56, 1 }
  0xa5   : > { %2986 = vxpose.xlu0.b32.start [1/4] (short) (narrow) %v2985_v19, 8  ;;  %2973 = vxpose.xlu1.b32.start [1/4] (short) (narrow) %v2972_v34, 8  ;;  %v871_v9 = vsel %vm693_vm6, %v870_v11, %v869_v57  ;;  %v950_v10 = vsel %vm690_vm5, %v949_v20, %v948_v61  ;;  %v705_v17 = vsel %vm687_vm4, %v704_v28, %v703_v35  ;;  %v791_v37 = vrot.slane %v3691_v56, 2 }
  0xa6   : > { %v873_v27 = vsel %vm696_vm7, %v872_v43, %v871_v9  ;;  %v952_v34 = vsel %vm693_vm6, %v951_v22, %v950_v10  ;;  %v707_v11 = vsel %vm690_vm5, %v706_v29, %v705_v17  ;;  %v780_v39 = vsel %vm678_vm1, %v3432_v4, %v779_v62 }
  0xa7   : > { %v954_v20 = vsel %vm696_vm7, %v953_v23, %v952_v34  ;;  %v709_v28 = vsel %vm693_vm6, %v708_v31, %v707_v11  ;;  %v782_v43 = vsel %vm681_vm2, %v781_v32, %v780_v39  ;;  %v874_v54 = vrot.slane %v3689_v48, 2 }
  0xa8   : > { %v2987_v22 = vpack.i.bf16 %v954_v20, %v873_v27  ;;  %v711_v2 = vsel %vm696_vm7, %v710_v36, %v709_v28  ;;  %v784_v29 = vsel %vm684_vm3, %v783_v33, %v782_v43  ;;  %v875_v62 = vrot.slane %v3709_v41, 1 }
  0xa9   : > { %v4657_v42 = vrot.slane %v3596_v21, 5  ;;  %v955_v31 = vrot.slane %v3689_v48, 3  ;;  %v956_v55 = vrot.slane %v3709_v41, 2  ;;  %v712_v32 = vrot.slane %v3709_v41, 7 }
  0xaa   : > { %2988 = vxpose.xlu0.b32.cont [2/4] (short) (narrow) %v2987_v22, 8  ;;  %v4658_v7 = vrot.slane %v3599_v63, 4  ;;  %v876_v58 = vsel %vm678_vm1, %v875_v62, %v874_v54  ;;  %v793_v33 = vrot.slane %v3689_v48, 1  ;;  %v888_v23 = vrot.slane %v3717_v52, 2 }
  0xab   : > { %v786_v60 = vsel %vm687_vm4, %v4657_v42, %v784_v29  ;;  %v4659_v12 = vrot.slane %v3602_v3, 3  ;;  %v877_v8 = vsel %vm681_vm2, %v3466_v25, %v876_v58  ;;  %v957_v16 = vsel %vm678_vm1, %v956_v55, %v955_v31  ;;  %v3858_v55 = vpop.permute.xlu0 %672 }
  0xac   : > { %v788_v53 = vsel %vm690_vm5, %v4658_v7, %v786_v60  ;;  %v713_v38 = vsel %vm678_vm1, %v712_v32, %v3689_v48  ;;  %v4660_v24 = vrot.slane %v3469_v26, 7  ;;  %v4661_v45 = vrot.slane %v3466_v25, 1 }
  0xad   : > { %v790_v0 = vsel %vm693_vm6, %v4659_v12, %v788_v53  ;;  %v4662_v57 = vrot.slane %v3466_v25, 6  ;;  %v4663_v36 = vrot.slane %v3476_v30, 6  ;;  %v4664_v17 = vrot.slane %v3469_v26, 5 }
  0xae   : > { %v792_v50 = vsel %vm696_vm7, %v791_v37, %v790_v0  ;;  %v879_v19 = vsel %vm684_vm3, %v4660_v24, %v877_v8  ;;  %v959_v49 = vsel %vm681_vm2, %v4661_v45, %v957_v16  ;;  %v4665_v27 = vrot.slane %v3532_v13, 5 }
  0xaf   : > { %v715_v61 = vsel %vm681_vm2, %v4662_v57, %v713_v38  ;;  %v2974_v35 = vpack.i.bf16 %v792_v50, %v711_v2  ;;  %v881_v9 = vsel %vm687_vm4, %v4663_v36, %v879_v19  ;;  %v960_v10 = vsel %vm684_vm3, %v3469_v26, %v959_v49 }
  0xb0   : > { %v717_v37 = vsel %vm684_vm3, %v4664_v17, %v715_v61  ;;  %v883_v34 = vsel %vm690_vm5, %v4665_v27, %v881_v9  ;;  %v4666_v11 = vrot.slane %v3476_v30, 7  ;;  %v4667_v20 = vrot.slane %v3476_v30, 4 }
  0xb1   : > { %v794_v43 = vsel %vm678_vm1, %v3709_v41, %v793_v33  ;;  %2975 = vxpose.xlu1.b32.cont [2/4] (short) (narrow) %v2974_v35, 8  ;;  %v4668_v54 = vrot.slane %v3535_v14, 4  ;;  %v4669_v2 = vrot.slane %v3532_v13, 6  ;;  %v4670_v62 = vrot.slane %v3532_v13, 3 }
  0xb2   : > { %v962_v39 = vsel %vm687_vm4, %v4666_v11, %v960_v10  ;;  %v719_v28 = vsel %vm687_vm4, %v4667_v20, %v717_v37  ;;  %v4671_v60 = vrot.slane %v3466_v25, 7  ;;  %v4672_v32 = vrot.slane %v3538_v15, 3 }
  0xb3   : > { %v885_v22 = vsel %vm693_vm6, %v4668_v54, %v883_v34  ;;  %v964_v29 = vsel %vm690_vm5, %v4669_v2, %v962_v39  ;;  %v721_v42 = vsel %vm690_vm5, %v4670_v62, %v719_v28  ;;  %v4673_v53 = vrot.slane %v3535_v14, 5 }
  0xb4   : > { %v796_v31 = vsel %vm681_vm2, %v4671_v60, %v794_v43  ;;  %v887_v7 = vsel %vm696_vm7, %v4672_v32, %v885_v22  ;;  %v4674_v33 = vrot.slane %v3535_v14, 2  ;;  %v4675_v0 = vrot.slane %v3469_v26, 6 }
  0xb5   : > { %v966_v58 = vsel %vm693_vm6, %v4673_v53, %v964_v29  ;;  %v4676_v16 = vrot.slane %v3538_v15, 4  ;;  %v4677_v50 = vrot.slane %v3538_v15, 1  ;;  %v4678_v19 = vrot.slane %v3476_v30, 5 }
  0xb6   : > { %v723_v12 = vsel %vm693_vm6, %v4674_v33, %v721_v42  ;;  %v798_v8 = vsel %vm684_vm3, %v4675_v0, %v796_v31  ;;  %v889_v49 = vrot.slane %v3715_v40, 1  ;;  %v4679_v61 = vrot.slane %v3532_v13, 4 }
  0xb7   : > { %v968_v38 = vsel %vm696_vm7, %v4676_v16, %v966_v58  ;;  %v725_v24 = vsel %vm696_vm7, %v4677_v50, %v723_v12  ;;  %v800_v45 = vsel %vm687_vm4, %v4678_v19, %v798_v8  ;;  %v969_v36 = vrot.slane %v3717_v52, 3 }
  0xb8   : > { %v2989_v57 = vpack.i.bf16 %v968_v38, %v887_v7  ;;  %v802_v35 = vsel %vm690_vm5, %v4679_v61, %v800_v45  ;;  %v970_v9 = vrot.slane %v3715_v40, 2  ;;  %v4680_v10 = vrot.slane %v3535_v14, 3 }
  0xb9   : > { %v890_v37 = vsel %vm678_vm1, %v889_v49, %v888_v23  ;;  %v972_v27 = vrot.slane %v3858_v55, 1  ;;  %v726_v34 = vrot.slane %v3715_v40, 7  ;;  %v4681_v11 = vrot.slane %v3538_v15, 2 }
  0xba   : > { %v804_v17 = vsel %vm693_vm6, %v4680_v10, %v802_v35  ;;  %2990 = vxpose.xlu0.b32.cont [3/4] (short) (narrow) %v2989_v57, 8  ;;  %v891_v20 = vsel %vm681_vm2, %v3858_v55, %v890_v37  ;;  %v971_v28 = vsel %vm678_vm1, %v970_v9, %v969_v36  ;;  %v728_v43 = vrot.slane %v3858_v55, 6 }
  0xbb   : > { %v806_v39 = vsel %vm696_vm7, %v4681_v11, %v804_v17  ;;  %v973_v22 = vsel %vm681_vm2, %v972_v27, %v971_v28  ;;  %v727_v23 = vsel %vm678_vm1, %v726_v34, %v3717_v52  ;;  %v807_v2 = vrot.slane %v3717_v52, 1 }
  0xbc   : > { %v2976_v54 = vpack.i.bf16 %v806_v39, %v725_v24  ;;  %v2991_v29 = vpack.i.bf16 %v973_v22, %v891_v20  ;;  %v729_v62 = vsel %vm681_vm2, %v728_v43, %v727_v23  ;;  %v809_v42 = vrot.slane %v3858_v55, 7 }
  0xbd   : > { %v1019_v60 = vrot.slane %v3707_v44, 6  ;;  %v808_v31 = vsel %vm678_vm1, %v3715_v40, %v807_v2  ;;  %v1021_v32 = vrot.slane %v3693_v47, 5  ;;  %v1101_v7 = vrot.slane %v3707_v44, 7 }
  0xbe   : > { %2977 = vxpose.xlu1.b32.cont [3/4] (short) (narrow) %v2976_v54, 8  ;;  %v1103_v53 = vrot.slane %v3693_v47, 6  ;;  %2992 = vxpose.xlu0.b32.end [4/4] (short) (narrow) %v2991_v29, 8  ;;  %v810_v58 = vsel %vm681_vm2, %v809_v42, %v808_v31  ;;  %v1184_v12 = vsel %vm693_vm6, %v3707_v44, %v3578_v5  ;;  %v1185_v0 = vrot.slane %v3693_v47, 7 }
  0xbf   : > { %v1020_v33 = vsel %vm693_vm6, %v1019_v60, %v3565_v46  ;;  %v2978_v8 = vpack.i.bf16 %v810_v58, %v729_v62  ;;  %v1102_v38 = vsel %vm693_vm6, %v1101_v7, %v3572_v51  ;;  %v1267_v50 = vrot.slane %v3707_v44, 1 }
  0xc0   : > { %v1022_v16 = vsel %vm696_vm7, %v1021_v32, %v1020_v33  ;;  %v1104_v24 = vsel %vm696_vm7, %v1103_v53, %v1102_v38  ;;  %v1186_v19 = vsel %vm696_vm7, %v1185_v0, %v1184_v12  ;;  %v1023_v46 = vrot.slane %v3684_v59, 4 }
  0xc1   : > { %v1035_v45 = vrot.slane %v3691_v56, 5  ;;  %v2998_v5 = vpack.i.bf16 %v1104_v24, %v1022_v16  ;;  %v1268_v49 = vsel %vm693_vm6, %v1267_v50, %v3587_v18  ;;  %v1105_v57 = vrot.slane %v3684_v59, 5 }
  0xc2   : > { %2979 = vxpose.xlu1.b32.end [4/4] (short) (narrow) %v2978_v8, 8  ;;  %v1117_v61 = vrot.slane %v3691_v56, 6  ;;  %v1269_v51 = vsel %vm696_vm7, %v3693_v47, %v1268_v49  ;;  %v4682_v44 = vrot.slane %v3432_v4, 3  ;;  %v1187_v36 = vrot.slane %v3684_v59, 6 }
  0xc3   : > { %v1199_v9 = vrot.slane %v3691_v56, 7  ;;  %2999 = vxpose.xlu0.b32.start [1/4] (short) (narrow) %v2998_v5, 8  ;;  %v3011_v10 = vpack.i.bf16 %v1269_v51, %v1186_v19  ;;  %v4683_v17 = vrot.slane %v3424_v1, 2  ;;  %v4684_v37 = vrot.slane %v3432_v4, 4 }
  0xc4   : > { %v1025_v35 = vsel %vm678_vm1, %v4682_v44, %v1023_v46  ;;  %v1270_v47 = vrot.slane %v3684_v59, 7  ;;  %v4685_v34 = vrot.slane %v3438_v6, 1  ;;  %v4686_v39 = vrot.slane %v3424_v1, 3 }
  0xc5   : > { %v1027_v18 = vsel %vm681_vm2, %v4683_v17, %v1025_v35  ;;  %v1107_v27 = vsel %vm678_vm1, %v4684_v37, %v1105_v57  ;;  %v4687_v28 = vrot.slane %v3432_v4, 5  ;;  %v1037_v54 = vrot.slane %v3689_v48, 4 }
  0xc6   : > { %v1029_v11 = vsel %vm684_vm3, %v4685_v34, %v1027_v18  ;;  %v1109_v20 = vsel %vm681_vm2, %v4686_v39, %v1107_v27  ;;  %3012 = vxpose.xlu1.b32.start [1/4] (short) (narrow) %v3011_v10, 8  ;;  %v4688_v59 = vrot.slane %v3438_v6, 2  ;;  %v4689_v2 = vrot.slane %v3424_v1, 4 }
  0xc7   : > { %v1189_v43 = vsel %vm678_vm1, %v4687_v28, %v1187_v36  ;;  %v1030_v22 = vsel %vm687_vm4, %v3596_v21, %v1029_v11  ;;  %v4690_v62 = vrot.slane %v3432_v4, 6  ;;  %v4691_v60 = vrot.slane %v3599_v63, 7 }
  0xc8   : > { %v1111_v23 = vsel %vm684_vm3, %v4688_v59, %v1109_v20  ;;  %v1191_v29 = vsel %vm681_vm2, %v4689_v2, %v1189_v43  ;;  %v4692_v32 = vrot.slane %v3596_v21, 1  ;;  %v4693_v53 = vrot.slane %v3438_v6, 3 }
  0xc9   : > { %v1272_v42 = vsel %vm678_vm1, %v4690_v62, %v1270_v47  ;;  %v1032_v31 = vsel %vm690_vm5, %v4691_v60, %v1030_v22  ;;  %v4694_v33 = vrot.slane %v3424_v1, 5  ;;  %v4695_v4 = vrot.slane %v3602_v3, 6 }
  0xca   : > { %v1113_v7 = vsel %vm687_vm4, %v4692_v32, %v1111_v23  ;;  %v1193_v58 = vsel %vm684_vm3, %v4693_v53, %v1191_v29  ;;  %v4696_v16 = vrot.slane %v3596_v21, 2  ;;  %v4697_v50 = vrot.slane %v3438_v6, 4 }
  0xcb   : > { %v1274_v12 = vsel %vm681_vm2, %v4694_v33, %v1272_v42  ;;  %v1034_v0 = vsel %vm693_vm6, %v4695_v4, %v1032_v31  ;;  %v1114_v8 = vsel %vm690_vm5, %v3599_v63, %v1113_v7  ;;  %v4698_v1 = vrot.slane %v3602_v3, 7 }
  0xcc   : > { %v1195_v38 = vsel %vm687_vm4, %v4696_v16, %v1193_v58  ;;  %v1276_v24 = vsel %vm684_vm3, %v4697_v50, %v1274_v12  ;;  %v1036_v19 = vsel %vm696_vm7, %v1035_v45, %v1034_v0  ;;  %v4699_v5 = vrot.slane %v3599_v63, 1 }
  0xcd   : > { %v1116_v46 = vsel %vm693_vm6, %v4698_v1, %v1114_v8  ;;  %v4700_v57 = vrot.slane %v3596_v21, 3  ;;  %v4701_v35 = vrot.slane %v3599_v63, 2  ;;  %v1038_v36 = vrot.slane %v3709_v41, 3 }
  0xce   : > { %v1197_v49 = vsel %vm690_vm5, %v4699_v5, %v1195_v38  ;;  %v1118_v44 = vsel %vm696_vm7, %v1117_v61, %v1116_v46  ;;  %v4702_v18 = vrot.slane %v3602_v3, 1  ;;  %v1119_v37 = vrot.slane %v3689_v48, 5 }
  0xcf   : > { %v1278_v51 = vsel %vm687_vm4, %v4700_v57, %v1276_v24  ;;  %v1198_v6 = vsel %vm693_vm6, %v3602_v3, %v1197_v49  ;;  %v3000_v10 = vpack.i.bf16 %v1118_v44, %v1036_v19  ;;  %v1039_v27 = vsel %vm678_vm1, %v1038_v36, %v1037_v54 }
  0xd0   : > { %v1280_v45 = vsel %vm690_vm5, %v4701_v35, %v1278_v51  ;;  %v1200_v17 = vsel %vm696_vm7, %v1199_v9, %v1198_v6  ;;  %v1120_v63 = vrot.slane %v3709_v41, 4  ;;  %v1201_v47 = vrot.slane %v3689_v48, 6 }
  0xd1   : > { %v1282_v21 = vsel %vm693_vm6, %v4702_v18, %v1280_v45  ;;  %3001 = vxpose.xlu0.b32.cont [2/4] (short) (narrow) %v3000_v10, 8  ;;  %v4703_v11 = vrot.slane %v3466_v25, 2  ;;  %v1202_v3 = vrot.slane %v3709_v41, 5  ;;  %v1284_v39 = vrot.slane %v3689_v48, 7 }
  0xd2   : > { %v1283_v61 = vsel %vm696_vm7, %v3691_v56, %v1282_v21  ;;  %v4704_v20 = vrot.slane %v3469_v26, 1  ;;  %v1121_v28 = vsel %vm678_vm1, %v1120_v63, %v1119_v37  ;;  %v1285_v43 = vrot.slane %v3709_v41, 6 }
  0xd3   : > { %v3013_v34 = vpack.i.bf16 %v1283_v61, %v1200_v17  ;;  %v1041_v9 = vsel %vm681_vm2, %v4703_v11, %v1039_v27  ;;  %v1051_v54 = vrot.slane %v3717_v52, 4  ;;  %v4705_v59 = vrot.slane %v3466_v25, 3  ;;  %v1341_v11 = vld [vmem:[%s4656_s22 + $0x10] sm:$0xff] }
  0xd4   : > { %v1043_v56 = vsel %vm684_vm3, %v4704_v20, %v1041_v9  ;;  %v1203_v48 = vsel %vm678_vm1, %v1202_v3, %v1201_v47  ;;  %v1052_v2 = vrot.slane %v3715_v40, 3  ;;  %v4706_v29 = vrot.slane %v3532_v13, 7 }
  0xd5   : > { %3014 = vxpose.xlu1.b32.cont [2/4] (short) (narrow) %v3013_v34, 8  ;;  %v1044_v22 = vsel %vm687_vm4, %v3476_v30, %v1043_v56  ;;  %v1123_v23 = vsel %vm681_vm2, %v4705_v59, %v1121_v28  ;;  %v4707_v41 = vrot.slane %v3469_v26, 2  ;;  %v4708_v60 = vrot.slane %v3466_v25, 4 }
  0xd6   : > { %v1046_v62 = vsel %vm690_vm5, %v4706_v29, %v1044_v22  ;;  %v1286_v32 = vsel %vm678_vm1, %v1285_v43, %v1284_v39  ;;  %v4709_v7 = vrot.slane %v3535_v14, 6  ;;  %v4710_v58 = vrot.slane %v3476_v30, 1 }
  0xd7   : > { %v1125_v42 = vsel %vm684_vm3, %v4707_v41, %v1123_v23  ;;  %v1205_v31 = vsel %vm681_vm2, %v4708_v60, %v1203_v48  ;;  %v4711_v12 = vrot.slane %v3469_v26, 3  ;;  %v4712_v0 = vrot.slane %v3466_v25, 5 }
  0xd8   : > { %v1048_v53 = vsel %vm693_vm6, %v4709_v7, %v1046_v62  ;;  %v1127_v33 = vsel %vm687_vm4, %v4710_v58, %v1125_v42  ;;  %v4713_v16 = vrot.slane %v3538_v15, 5  ;;  %v4714_v24 = vrot.slane %v3476_v30, 2 }
  0xd9   : > { %v1207_v4 = vsel %vm684_vm3, %v4711_v12, %v1205_v31  ;;  %v1288_v8 = vsel %vm681_vm2, %v4712_v0, %v1286_v32  ;;  %v1128_v50 = vsel %vm690_vm5, %v3532_v13, %v1127_v33  ;;  %v4715_v1 = vrot.slane %v3469_v26, 4 }
  0xda   : > { %v1050_v38 = vsel %vm696_vm7, %v4713_v16, %v1048_v53  ;;  %v1209_v19 = vsel %vm687_vm4, %v4714_v24, %v1207_v4  ;;  %v4716_v5 = vrot.slane %v3535_v14, 7  ;;  %v4717_v49 = vrot.slane %v3532_v13, 1 }
  0xdb   : > { %v1290_v46 = vsel %vm684_vm3, %v4715_v1, %v1288_v8  ;;  %v4718_v51 = vrot.slane %v3476_v30, 3  ;;  %v1053_v6 = vsel %vm678_vm1, %v1052_v2, %v1051_v54  ;;  %v4719_v35 = vrot.slane %v3538_v15, 6  ;;  %v1498_v1 = vld [vmem:[%s4723_s28 + $0x8] sm:$0xff] }
  0xdc   : > { %v1130_v25 = vsel %vm693_vm6, %v4716_v5, %v1128_v50  ;;  %v1211_v57 = vsel %vm690_vm5, %v4717_v49, %v1209_v19  ;;  %v4720_v36 = vrot.slane %v3532_v13, 2  ;;  %v1054_v17 = vrot.slane %v3858_v55, 2  ;;  %v1497_v19 = vld [vmem:[%s4723_s28] sm:$0xff]  ;;  %s593_s28 = sand.u32 1, %s3250_s30  }
  0xdd   : > { %v1292_v44 = vsel %vm687_vm4, %v4718_v51, %v1290_v46  ;;  %v1132_v26 = vsel %vm696_vm7, %v4719_v35, %v1130_v25  ;;  %v1212_v45 = vsel %vm693_vm6, %v3535_v14, %v1211_v57  ;;  %v4721_v30 = vrot.slane %v3538_v15, 7  ;;  %v2699_v25 = vld [vmem:[%s4724_s20] ss:$0 sm:$0xff]  ;;  %s594_s27 = scalar_lea.vmem [#allocation3], %s593_s28  ;;  %s2615_s20 = scalar_lea.sflag [#allocation4], %s593_s28 }
  0xde   : > { %v1294_v10 = vsel %vm690_vm5, %v4720_v36, %v1292_v44  ;;  %v3002_v18 = vpack.i.bf16 %v1132_v26, %v1050_v38  ;;  %v4722_v37 = vrot.slane %v3535_v14, 1  ;;  %v1133_v27 = vrot.slane %v3717_v52, 5  ;;  %v1342_v14 = vld [vmem:[%s4656_s22 + $0x18] sm:$0x7]  ;;  %s2766_s22 = sshll.u32 %s3386_s1, 4  ;;  %s2627_s24 = sshll.u32 %s594_s27, 4  ;;  %s4578_s24 = int_to_ptr.vmem [resolvable:$true] %s2627_s24 }
  0xdf   : > { %v1214_v21 = vsel %vm696_vm7, %v4721_v30, %v1212_v45  ;;  %v1055_v13 = vsel %vm681_vm2, %v1054_v17, %v1053_v6  ;;  %v1134_v47 = vrot.slane %v3715_v40, 4  ;;  %v1136_v34 = vrot.slane %v3858_v55, 3  ;;  %s4576_s23 = scalar_lea.hbm %s4638_s19, %s2766_s22  ;;  %s3196_s25 = scalar_lea.vmem %s4578_s24, 16 }
  0xe0   : > { %v1296_v61 = vsel %vm693_vm6, %v4722_v37, %v1294_v10  ;;  %3003 = vxpose.xlu0.b32.cont [3/4] (short) (narrow) %v3002_v18, 8  ;;  %v1215_v3 = vrot.slane %v3717_v52, 6  ;;  %v1218_v39 = vrot.slane %v3858_v55, 4  ;;  %v1298_v56 = vrot.slane %v3717_v52, 7  ;;  %p3197_p11 = scmp.ne.s32.totalorder %s4578_s24, %s3196_s25  ;;  %s3264_s1 = smov [#allocation3]  }
  0xe1   : > { %v1297_v63 = vsel %vm696_vm7, %v3538_v15, %v1296_v61  ;;  %v1216_v15 = vrot.slane %v3715_v40, 5  ;;  %v1135_v20 = vsel %vm678_vm1, %v1134_v47, %v1133_v27  ;;  %v1299_v28 = vrot.slane %v3715_v40, 6 }
  0xe2   : > { %v3015_v9 = vpack.i.bf16 %v1297_v63, %v1214_v21  ;;  %v1301_v43 = vrot.slane %v3858_v55, 5  ;;  %v1137_v54 = vsel %vm681_vm2, %v1136_v34, %v1135_v20  ;;  %v1348_v59 = vpack.c.bf16 %v1342_v14, %v1341_v11  ;;  %p3198_p12 = pnand %p3197_p11, %p3403_p5 }
  0xe3   : > { %v1217_v22 = vsel %vm678_vm1, %v1216_v15, %v1215_v3  ;;  %v3004_v23 = vpack.i.bf16 %v1137_v54, %v1055_v13  ;;  %v1300_v2 = vsel %vm678_vm1, %v1299_v28, %v1298_v56  ;;  %v3261_v40 = vmov 65535  }
  0xe4   : > { %3016 = vxpose.xlu1.b32.cont [3/4] (short) (narrow) %v3015_v9, 8  ;;  %v1219_v48 = vsel %vm681_vm2, %v1218_v39, %v1217_v22  ;;  %v1302_v29 = vsel %vm681_vm2, %v1301_v43, %v1300_v2  ;;  %v1371_v62 = vsel %vm1369_vm8, 4294967295, %v3261_v40  ;;  %v1503_v46 = vpack.c.bf16 %v1498_v1, %v1497_v19  ;;  %v2024_v1 = vld [vmem:[%s4626_s7] sm:$0xff]  ;;  %p3199_p13 = pneg %p3198_p12 }
  0xe5   : > { %3005 = vxpose.xlu0.b32.end [4/4] (short) (narrow) %v3004_v23, 8  ;;  %v3017_v52 = vpack.i.bf16 %v1302_v29, %v1219_v48  ;;  %v1372_v55 = vsel %vm1370_vm9, %v1371_v62, 0  ;;  %v3262_v5 = vmov 0.0   ;;  %vm2262_vm1 = vcmask 195584  }
  0xe6   : > { %v1374_v41 = vand.u32 %v1372_v55, %v1348_v59  ;;  %1648 = vst.msk [vmem:[#allocation2 + $0x8] sm:$0x3] %vm1647_vm13, %v3262_v5  ;;  %1654 = vst.msk [vmem:[#allocation2 + $0x38] sm:$0x3] %vm1647_vm13, %v3262_v5  ;;  %vm2455_vm2 = vcmask 523264   ;;  %vm2601_vm3 = vcmask 8192  }
  0xe7   : > { %1653 = vst.msk [vmem:[#allocation2 + $0x30] sm:$0xff] %vm1645_vm12, %v3262_v5  ;;  %1646 = vst.msk [vmem:[#allocation2] sm:$0xff] %vm1645_vm12, %v3262_v5 }
  0xe8   : > { %3018 = vxpose.xlu1.b32.end [4/4] (short) (narrow) %v3017_v52, 8  ;;  %2813 = vmatprep.subr.bf16.mxu0 %v1374_v41  ;;  %1666 = vst.msk [vmem:[#allocation2 + $0x98] sm:$0x3] %vm1647_vm13, %v3262_v5  ;;  %1650 = vst.msk [vmem:[#allocation2 + $0x18] sm:$0x3] %vm1647_vm13, %v3262_v5 }
  0xe9   : > { %2904 = vmatprep.subr.bf16.mxu1 %v1374_v41  ;;  %2814 = vmatpush3.bf16.msra.mxu0 %v1374_v41  ;;  %1649 = vst.msk [vmem:[#allocation2 + $0x10] sm:$0xff] %vm1645_vm12, %v3262_v5  ;;  %1651 = vst.msk [vmem:[#allocation2 + $0x20] sm:$0xff] %vm1645_vm12, %v3262_v5 }
  0xea   : > { %2906 = vmatpush3.bf16.msra.mxu1 %v1374_v41  ;;  %2841 = vmatprep.subr.bf16.mxu0 %v3262_v5  ;;  %1652 = vst.msk [vmem:[#allocation2 + $0x28] sm:$0x3] %vm1647_vm13, %v3262_v5  ;;  %1656 = vst.msk [vmem:[#allocation2 + $0x48] sm:$0x3] %vm1647_vm13, %v3262_v5 }
  0xeb   : > { %2823 = vmatprep.subr.bf16.mxu1 %v1503_v46  ;;  %1655 = vst.msk [vmem:[#allocation2 + $0x40] sm:$0xff] %vm1645_vm12, %v3262_v5  ;;  %1657 = vst.msk [vmem:[#allocation2 + $0x50] sm:$0xff] %vm1645_vm12, %v3262_v5 }
  0xec   : > { %1658 = vst.msk [vmem:[#allocation2 + $0x58] sm:$0x3] %vm1647_vm13, %v3262_v5  ;;  %1660 = vst.msk [vmem:[#allocation2 + $0x68] sm:$0x3] %vm1647_vm13, %v3262_v5 }
  0xed   : > { %1659 = vst.msk [vmem:[#allocation2 + $0x60] sm:$0xff] %vm1645_vm12, %v3262_v5  ;;  %1661 = vst.msk [vmem:[#allocation2 + $0x70] sm:$0xff] %vm1645_vm12, %v3262_v5 }
  0xee   : > { %1662 = vst.msk [vmem:[#allocation2 + $0x78] sm:$0x3] %vm1647_vm13, %v3262_v5  ;;  %1664 = vst.msk [vmem:[#allocation2 + $0x88] sm:$0x3] %vm1647_vm13, %v3262_v5 }
  0xef   : > { %1663 = vst.msk [vmem:[#allocation2 + $0x80] sm:$0xff] %vm1645_vm12, %v3262_v5  ;;  %1665 = vst.msk [vmem:[#allocation2 + $0x90] sm:$0xff] %vm1645_vm12, %v3262_v5 }
 0x132   : > { %v2993_v42 = vpop.trf.xlu0 }
 0x133   : > { %v2997_v60 = vunpack.i.h.bf16 %v2993_v42  ;;  %v2994_v31 = vunpack.i.l.bf16 %v2993_v42 }
 0x135   : > { %v1344_v58 = vpack.c.bf16 %v2997_v60, %v2994_v31 }
 0x136   : > { %v2980_v32 = vpop.trf.xlu1 }
 0x137   : > { %v2984_v7 = vunpack.i.h.bf16 %v2980_v32  ;;  %v2981_v53 = vunpack.i.l.bf16 %v2980_v32 }
 0x139   : > { %v1343_v33 = vpack.c.bf16 %v2984_v7, %v2981_v53 }
 0x13b   : > { %2815 = vmatprep.mubr.msk.bf16.mxu0 %vm1356_vm10, %v1343_v33 }
 0x13c   : > { %2816 = vmatmul.mubr.msk.bf16.vlgmr.msra.gmra.mrb[0].mxu0 %vm1356_vm10, %v1344_v58 }
 0x13d   : > { %2843 = vmatprep.mubr.msk.bf16.mxu0 %vm3263_vm14, %v3262_v5 }
 0x159   : > { %v3006_v12 = vpop.trf.xlu0 }
 0x15a   : > { %v3010_v4 = vunpack.i.h.bf16 %v3006_v12  ;;  %v3007_v0 = vunpack.i.l.bf16 %v3006_v12 }
 0x15c   : > { %v3019_v8 = vpop.trf.xlu1  ;;  %v1345_v50 = vpack.c.bf16 %v3010_v4, %v3007_v0 }
 0x15d   : > { %v3023_v16 = vunpack.i.h.bf16 %v3019_v8  ;;  %v3020_v38 = vunpack.i.l.bf16 %v3019_v8 }
 0x15e   : > { %2819 = vmatprep.mubr.msk.bf16.mxu1 %vm1356_vm10, %v1345_v50 }
 0x15f   : > { %v1346_v24 = vpack.c.bf16 %v3023_v16, %v3020_v38 }
 0x161   : > { %2820 = vmatmul.mubr.msk.bf16.vlgmr.msra.gmra.mrb[0].mxu1 %vm1356_vm10, %v1346_v24 }
 0x162   : > { %2824 = vmatpush3.bf16.msra.mxu1 %v1503_v46  ;;  %v2025_v46 = vld [vmem:[%s4626_s7 + $0x8] sm:$0xff] }
 0x163   : > { %2833 = vmatprep.subr.bf16.mxu1 %v3262_v5 }
 0x20f   : > { %v2817_v49 = vpop.f32.mrb[0].mxu0 }
 0x210   : > { %v1419_v57 = vadd.f32 %v2817_v49, %v2699_v25  ;;  %v1410_v51 = vpop.f32.mrb[1].mxu0  ;;  %v2029_v49 = vpack.c.bf16 %v2025_v46, %v2024_v1 }
 0x211   : > { %v1411_v44 = vadd.f32 %v2699_v25, %v1410_v51  ;;  %v2818_v6 = vpop.f32.mrb[2].mxu0 }
 0x212   : > { %v2706_v35 = vmul.f32 -1.442695, %v1419_v57  ;;  %v1422_v26 = vadd.f32 %v2818_v6, %v2699_v25  ;;  %v1413_v45 = vpop.f32.mrb[3].mxu0 }
 0x213   : > { %v2704_v36 = vmul.f32 -1.442695, %v1411_v44  ;;  %v1414_v10 = vadd.f32 %v2699_v25, %v1413_v45 }
 0x214   : > { %3024 = vpow2.f32 %v2706_v35  ;;  %v2707_v17 = vmul.f32 -1.442695, %v1422_v26 }
 0x215   : > { %3026 = vpow2.f32 %v2704_v36  ;;  %v2705_v18 = vmul.f32 -1.442695, %v1414_v10 }
 0x216   : > { %3028 = vpow2.f32 %v2707_v17 }
 0x217   : > { %3030 = vpow2.f32 %v2705_v18 }
 0x21e   : > { %v3025_v30 = vpop.eup %3024 }
 0x21f   : > { %v3027_v21 = vpop.eup %3026  ;;  %v1467_v37 = vadd.f32 1.0, %v3025_v30 }
 0x220   : > { %v3029_v61 = vpop.eup %3028  ;;  %v1465_v27 = vadd.f32 1.0, %v3027_v21 }
 0x221   : > { %v3031_v63 = vpop.eup %3030  ;;  %3032 = vrcp.f32 %v1467_v37  ;;  %v1468_v13 = vadd.f32 1.0, %v3029_v61 }
 0x222   : > { %3034 = vrcp.f32 %v1465_v27  ;;  %v1466_v47 = vadd.f32 1.0, %v3031_v63 }
 0x223   : > { %3036 = vrcp.f32 %v1468_v13 }
 0x224   : > { %3038 = vrcp.f32 %v1466_v47  ;;  %v1686_v47 = vlaneseq }
 0x22b   : > { %v3033_v11 = vpop.eup %3032 }
 0x22c   : > { %v3035_v3 = vpop.eup %3034  ;;  %v1491_v22 = vmul.f32 %v3033_v11, %v1419_v57  ;;  %v2027_v57 = vld [vmem:[%s4626_s7 + $0x18] sm:$0xff] }
 0x22d   : > { %v3037_v20 = vpop.eup %3036  ;;  %v1489_v2 = vmul.f32 %v3035_v3, %v1411_v44  ;;  %v2712_v44 = vld [vmem:[%s4725_s4] ss:$0 sm:$0xff] }
 0x22e   : > { %v3039_v54 = vpop.eup %3038  ;;  %v1492_v59 = vmul.f32 %v3037_v20, %v1422_v26 }
 0x22f   : > { %v1490_v29 = vmul.f32 %v3039_v54, %v1414_v10 }
 0x230   : > { %v1500_v40 = vpack.c.bf16 %v1492_v59, %v1491_v22 }
 0x231   : > { %v1499_v55 = vpack.c.bf16 %v1490_v29, %v1489_v2 }
 0x233   : > { %2825 = vmatprep.mubr.msk.bf16.mxu1 %vm1511_vm11, %v1499_v55 }
 0x234   : > { %v2821_v34 = vpop.f32.mrb[0].mxu1  ;;  %2826 = vmatmul.mubr.msk.bf16.vlgmr.msra.gmra.mrb[4].mxu1 %vm1511_vm11, %v1500_v40  ;;  %v1706_v40 = vld [vmem:[#allocation2 + $0x1] sm:$0xff] }
 0x235   : > { %v1435_v14 = vadd.f32 %v2821_v34, %v2699_v25  ;;  %v1426_v9 = vpop.f32.mrb[1].mxu1  ;;  %2834 = vmatpush3.bf16.msra.mxu1 %v2029_v49 }
 0x236   : > { %v1427_v15 = vadd.f32 %v2699_v25, %v1426_v9  ;;  %v2822_v39 = vpop.f32.mrb[2].mxu1  ;;  %2835 = vmatprep.subr.bf16.mxu1 %v3262_v5 }
 0x237   : > { %v2710_v56 = vmul.f32 -1.442695, %v1435_v14  ;;  %v1438_v28 = vadd.f32 %v2822_v39, %v2699_v25  ;;  %v1429_v43 = vpop.f32.mrb[3].mxu1 }
 0x238   : > { %v2708_v23 = vmul.f32 -1.442695, %v1427_v15  ;;  %v1430_v48 = vadd.f32 %v2699_v25, %v1429_v43  ;;  %v2026_v25 = vld [vmem:[%s4626_s7 + $0x10] sm:$0xff] }
 0x239   : > { %3040 = vpow2.f32 %v2710_v56  ;;  %v2711_v52 = vmul.f32 -1.442695, %v1438_v28  ;;  %v2030_v51 = vpack.c.bf16 %v2027_v57, %v2026_v25  ;;  %v4198_v56 = vld [vmem:[%s4726_s5] sm:$0xff] }
 0x23a   : > { %3042 = vpow2.f32 %v2708_v23  ;;  %v2709_v62 = vmul.f32 -1.442695, %v1430_v48 }
 0x23b   : > { %3044 = vpow2.f32 %v2711_v52  ;;  %2836 = vmatpush3.bf16.msra.mxu1 %v2030_v51  ;;  %v1678_v52 = vld [vmem:[#allocation2] sm:$0xff] }
 0x23c   : > { %3046 = vpow2.f32 %v2709_v62 }
 0x243   : > { %v3041_v41 = vpop.eup %3040 }
 0x244   : > { %v3043_v42 = vpop.eup %3042  ;;  %v1471_v60 = vadd.f32 1.0, %v3041_v41 }
 0x245   : > { %v3045_v31 = vpop.eup %3044  ;;  %v1469_v32 = vadd.f32 1.0, %v3043_v42 }
 0x246   : > { %v3047_v7 = vpop.eup %3046  ;;  %3048 = vrcp.f32 %v1471_v60  ;;  %v1472_v53 = vadd.f32 1.0, %v3045_v31 }
 0x247   : > { %3050 = vrcp.f32 %v1469_v32  ;;  %v1470_v58 = vadd.f32 1.0, %v3047_v7 }
 0x248   : > { %3052 = vrcp.f32 %v1472_v53 }
 0x249   : > { %3054 = vrcp.f32 %v1470_v58 }
 0x250   : > { %v3049_v33 = vpop.eup %3048 }
 0x251   : > { %v3051_v12 = vpop.eup %3050  ;;  %v1495_v8 = vmul.f32 %v3049_v33, %v1435_v14 }
 0x252   : > { %v3053_v4 = vpop.eup %3052  ;;  %v1493_v38 = vmul.f32 %v3051_v12, %v1427_v15  ;;  %v4191_v15 = vshrl.u32 %v1686_v47, 7 }
 0x253   : > { %v3055_v0 = vpop.eup %3054  ;;  %v1496_v16 = vmul.f32 %v3053_v4, %v1438_v28 }
 0x254   : > { %v1494_v50 = vmul.f32 %v3055_v0, %v1430_v48  ;;  %v1688_v39 = vsub.s32 0, %v4191_v15  ;;  %v1716_v20 = vsub.s32 1, %v4191_v15  ;;  %v1744_v28 = vsub.s32 2, %v4191_v15 }
 0x255   : > { %v1502_v24 = vpack.c.bf16 %v1496_v16, %v1495_v8  ;;  %v1734_v16 = vld [vmem:[#allocation2 + $0x2] sm:$0xff]  ;;  %v1828_v49 = vsub.s32 5, %v4191_v15 }
 0x256   : > { %v1501_v19 = vpack.c.bf16 %v1494_v50, %v1493_v38  ;;  %v4204_v22 = vrot.slane %v4198_v56, %v1688_v39  ;;  %v4207_v59 = vrot.slane %v4198_v56, %v1716_v20  ;;  %v4217_v7 = vrot.slane %v4198_v56, %v1744_v28 }
 0x257   : > { %v1772_v50 = vsub.s32 3, %v4191_v15 }
 0x258   : > { %2829 = vmatprep.mubr.msk.bf16.mxu1 %vm1511_vm11, %v1501_v19  ;;  %v1690_v12 = vmul.f32 %v4204_v22, %v1678_v52  ;;  %v1718_v4 = vmul.f32 %v4207_v59, %v1706_v40  ;;  %v1800_v19 = vsub.s32 4, %v4191_v15  ;;  %v1746_v46 = vmul.f32 %v4217_v7, %v1734_v16 }
 0x259   : > { %2830 = vmatmul.mubr.msk.bf16.gmra.mrb[8].mxu1 %vm1511_vm11, %v1502_v24  ;;  %v4234_v25 = vrot.slane %v4198_v56, %v1772_v50 }
 0x25a   : > { %2837 = vmatprep.mubr.msk.bf16.mxu1 %vm3263_vm14, %v3262_v5  ;;  %v1726_v1 = vadd.f32 %v1718_v4, %v1690_v12 }
 0x307   : > { %v2827_v6 = vpop.f32.mrb[4].mxu1 }
 0x308   : > { %v1567_v35 = vadd.f32 %v2827_v6, %v2712_v44  ;;  %v1558_v26 = vpop.f32.mrb[5].mxu1 }
 0x309   : > { %v1559_v45 = vadd.f32 %v2712_v44, %v1558_v26  ;;  %v2828_v36 = vpop.f32.mrb[6].mxu1  ;;  %v1857_v26 = vsub.s32 6, %v4191_v15 }
 0x30a   : > { %v2719_v10 = vmul.f32 -1.442695, %v1567_v35  ;;  %v1570_v17 = vadd.f32 %v2828_v36, %v2712_v44  ;;  %v1561_v18 = vpop.f32.mrb[7].mxu1 }
 0x30b   : > { %v2717_v30 = vmul.f32 -1.442695, %v1559_v45  ;;  %v1562_v21 = vadd.f32 %v2712_v44, %v1561_v18 }
 0x30c   : > { %3056 = vpow2.f32 %v2719_v10  ;;  %v2720_v37 = vmul.f32 -1.442695, %v1570_v17  ;;  %v4244_v10 = vrot.slane %v4198_v56, %v1828_v49 }
 0x30d   : > { %3058 = vpow2.f32 %v2717_v30  ;;  %v2718_v61 = vmul.f32 -1.442695, %v1562_v21 }
 0x30e   : > { %3060 = vpow2.f32 %v2720_v37 }
 0x30f   : > { %3062 = vpow2.f32 %v2718_v61 }
 0x316   : > { %v3057_v27 = vpop.eup %3056 }
 0x317   : > { %v3059_v63 = vpop.eup %3058  ;;  %v1615_v13 = vadd.f32 1.0, %v3057_v27 }
 0x318   : > { %v3061_v34 = vpop.eup %3060  ;;  %v1613_v11 = vadd.f32 1.0, %v3059_v63 }
 0x319   : > { %v3063_v14 = vpop.eup %3062  ;;  %3064 = vrcp.f32 %v1615_v13  ;;  %v1616_v9 = vadd.f32 1.0, %v3061_v34 }
 0x31a   : > { %3066 = vrcp.f32 %v1613_v11  ;;  %v1614_v3 = vadd.f32 1.0, %v3063_v14  ;;  %v4251_v11 = vrot.slane %v4198_v56, %v1857_v26 }
 0x31b   : > { %3068 = vrcp.f32 %v1616_v9 }
 0x31c   : > { %3070 = vrcp.f32 %v1614_v3 }
 0x323   : > { %v3065_v54 = vpop.eup %3064 }
 0x324   : > { %v3067_v2 = vpop.eup %3066  ;;  %v1639_v29 = vmul.f32 %v3065_v54, %v1567_v35  ;;  %v1754_v35 = vadd.f32 %v1746_v46, %v1726_v1 }
 0x325   : > { %v3069_v41 = vpop.eup %3068  ;;  %v1637_v42 = vmul.f32 %v3067_v2, %v1559_v45 }
 0x326   : > { %v3071_v32 = vpop.eup %3070  ;;  %1670 = vst.msk [vmem:[#allocation2 + $0x31] sm:$0xff] %vm1645_vm12, %v1639_v29  ;;  %v1640_v53 = vmul.f32 %v3069_v41, %v1570_v17  ;;  %v1885_v17 = vsub.s32 7, %v4191_v15 }
 0x327   : > { %1668 = vst.msk [vmem:[#allocation2 + $0x11] sm:$0xff] %vm1645_vm12, %v1637_v42  ;;  %v1638_v0 = vmul.f32 %v3071_v32, %v1562_v21 }
 0x328   : > { %1671 = vst.msk [vmem:[#allocation2 + $0x41] sm:$0xff] %vm1645_vm12, %v1640_v53  ;;  %v4254_v20 = vrot.slane %v4198_v56, %v1885_v17 }
 0x329   : > { %1669 = vst.msk [vmem:[#allocation2 + $0x21] sm:$0xff] %vm1645_vm12, %v1638_v0 }
 0x32c   : > { %v2831_v43 = vpop.f32.mrb[8].mxu1 }
 0x32d   : > { %v4209_v23 = vadd.f32 %v2831_v43, %v2712_v44  ;;  %v1574_v48 = vpop.f32.mrb[9].mxu1  ;;  %v1681_v61 = vld [vmem:[#allocation2 + $0x30] sm:$0xff] }
 0x32e   : > { %v4211_v62 = vadd.f32 %v2712_v44, %v1574_v48  ;;  %v2832_v55 = vpop.f32.mrb[10].mxu1  ;;  %v1679_v57 = vld [vmem:[#allocation2 + $0x10] sm:$0xff]  ;;  %v1693_v2 = vmul.f32 %v4204_v22, %v1681_v61  ;;  %v1776_v41 = vmul.f32 %v4234_v25, %v1681_v61 }
 0x32f   : > { %v4213_v60 = vadd.f32 %v2832_v55, %v2712_v44  ;;  %v1577_v31 = vpop.f32.mrb[11].mxu1  ;;  %v2723_v58 = vmul.f32 -1.442695, %v4209_v23  ;;  %v1707_v51 = vld [vmem:[#allocation2 + $0x11] sm:$0xff]  ;;  %v1691_v45 = vmul.f32 %v4204_v22, %v1679_v57  ;;  %v1774_v18 = vmul.f32 %v4234_v25, %v1679_v57  ;;  %v1682_v17 = vld [vmem:[#allocation2 + $0x40] sm:$0xff] }
 0x330   : > { %v4220_v33 = vadd.f32 %v2712_v44, %v1577_v31  ;;  %v2721_v8 = vmul.f32 -1.442695, %v4211_v62  ;;  %v4238_v44 = vrot.slane %v4198_v56, %v1800_v19  ;;  %v1735_v6 = vld [vmem:[#allocation2 + $0x12] sm:$0xff]  ;;  %v1719_v36 = vmul.f32 %v4207_v59, %v1707_v51  ;;  %v1680_v37 = vld [vmem:[#allocation2 + $0x20] sm:$0xff] }
 0x331   : > { %v2724_v38 = vmul.f32 -1.442695, %v4213_v60  ;;  %3072 = vpow2.f32 %v2723_v58  ;;  %v1747_v21 = vmul.f32 %v4217_v7, %v1735_v6  ;;  %v1709_v27 = vld [vmem:[#allocation2 + $0x31] sm:$0xff]  ;;  %v1782_v63 = vadd.f32 %v1774_v18, %v1754_v35  ;;  %v1708_v47 = vld [vmem:[#allocation2 + $0x21] sm:$0xff]  ;;  %v4281_v18 = vld [vmem:[%s4727_s6] ss:$0 sm:$0xff] }
 0x332   : > { %v2722_v24 = vmul.f32 -1.442695, %v4220_v33  ;;  %3074 = vpow2.f32 %v2721_v8  ;;  %v1727_v30 = vadd.f32 %v1719_v36, %v1691_v45  ;;  %v1802_v13 = vmul.f32 %v4238_v44, %v1707_v51  ;;  %v1736_v9 = vld [vmem:[#allocation2 + $0x22] sm:$0xff]  ;;  %v1737_v50 = vld [vmem:[#allocation2 + $0x32] sm:$0xff] }
 0x333   : > { %3076 = vpow2.f32 %v2724_v38  ;;  %v1830_v43 = vmul.f32 %v4244_v10, %v1735_v6  ;;  %v1692_v54 = vmul.f32 %v4204_v22, %v1680_v37  ;;  %v1721_v29 = vmul.f32 %v4207_v59, %v1709_v27  ;;  %v4271_v38 = vld [vmem:[%s4726_s5 + $0x8] ss:$0 sm:$0xff]  ;;  %s3200_s5 = sshll.u32 %s3264_s1, 4  ;;  %s3201_s5 = int_to_ptr.vmem [resolvable:$false] %s3200_s5 }
 0x334   : > { %3078 = vpow2.f32 %v2722_v24  ;;  %v1755_v14 = vadd.f32 %v1747_v21, %v1727_v30  ;;  %v1810_v28 = vadd.f32 %v1802_v13, %v1782_v63  ;;  %v1720_v52 = vmul.f32 %v4207_v59, %v1708_v47  ;;  %v1710_v63 = vld [vmem:[#allocation2 + $0x41] sm:$0xff]  ;;  %s3202_s6 = scalar_lea.vmem %s3201_s5, 32  ;;  %p3203_p0 = scmp.lt.s32.totalorder %s4578_s24, %s3201_s5 }
 0x335   : > { %v1775_v40 = vmul.f32 %v4234_v25, %v1680_v37  ;;  %v1748_v56 = vmul.f32 %v4217_v7, %v1736_v9  ;;  %v1803_v31 = vmul.f32 %v4238_v44, %v1708_v47  ;;  %v1831_v58 = vmul.f32 %v4244_v10, %v1736_v9  ;;  %p3204_p1 = scmp.lt.s32.totalorder %s3202_s6, %s3196_s25 }
 0x336   : > { %v1838_v42 = vadd.f32 %v1830_v43, %v1810_v28  ;;  %v1728_v32 = vadd.f32 %v1720_v52, %v1692_v54  ;;  %v1859_v12 = vmul.f32 %v4251_v11, %v1680_v37  ;;  %v1887_v4 = vmul.f32 %v4254_v20, %v1708_v47 }
 0x337   : > { %v1783_v53 = vadd.f32 %v1775_v40, %v1755_v14  ;;  %v1804_v49 = vmul.f32 %v4238_v44, %v1709_v27  ;;  %v1860_v57 = vmul.f32 %v4251_v11, %v1681_v61  ;;  %v1915_v51 = vmul.f32 %v4271_v38, %v1736_v9  ;;  %p3205_p2 = por %p3204_p1, %p3203_p0 }
 0x338   : > { %v1756_v24 = vadd.f32 %v1748_v56, %v1728_v32  ;;  %v1867_v1 = vadd.f32 %v1859_v12, %v1838_v42  ;;  %v1832_v45 = vmul.f32 %v4244_v10, %v1737_v50  ;;  %v1888_v36 = vmul.f32 %v4254_v20, %v1709_v27 }
 0x339   : > { %v1811_v19 = vadd.f32 %v1803_v31, %v1783_v53  ;;  %v1729_v61 = vadd.f32 %v1721_v29, %v1693_v2  ;;  %v1861_v13 = vmul.f32 %v4251_v11, %v1682_v17  ;;  %v1749_v27 = vmul.f32 %v4217_v7, %v1737_v50  ;;  %p3206_p3 = pnand %p3205_p2, %p3199_p13 }
 0x33a   : > { %v1784_v6 = vadd.f32 %v1776_v41, %v1756_v24  ;;  %v1895_v26 = vadd.f32 %v1887_v4, %v1867_v1  ;;  %v1916_v9 = vmul.f32 %v4271_v38, %v1737_v50  ;;  %v1889_v28 = vmul.f32 %v4254_v20, %v1710_v63  ;;  %v1882_v1 = vld [vmem:[#allocation2 + $0x91] sm:$0xff] }
 0x33b   : > { %v3073_v34 = vpop.eup %3072  ;;  %v1839_v35 = vadd.f32 %v1831_v58, %v1811_v19  ;;  %v1694_v42 = vmul.f32 %v4204_v22, %v1682_v17  ;;  %v1722_v53 = vmul.f32 %v4207_v59, %v1710_v63  ;;  %v1854_v19 = vld [vmem:[#allocation2 + $0x90] sm:$0xff] }
 0x33c   : > { %v3075_v3 = vpop.eup %3074  ;;  %v1619_v0 = vadd.f32 1.0, %v3073_v34  ;;  %v1812_v30 = vadd.f32 %v1804_v49, %v1784_v6  ;;  %v1923_v37 = vadd.f32 %v1915_v51, %v1895_v26 }
 0x33d   : > { %v3077_v48 = vpop.eup %3076  ;;  %v1617_v8 = vadd.f32 1.0, %v3075_v3  ;;  %v1868_v21 = vadd.f32 %v1860_v57, %v1839_v35  ;;  %v1738_v3 = vld [vmem:[#allocation2 + $0x42] sm:$0xff]  ;;  %v4318_v35 = vmul.f32 %v4254_v20, %v1882_v1 }
 0x33e   : > { %v3079_v55 = vpop.eup %3078  ;;  %v1620_v16 = vadd.f32 1.0, %v3077_v48  ;;  %3080 = vrcp.f32 %v1619_v0  ;;  %v1840_v47 = vadd.f32 %v1832_v45, %v1812_v30  ;;  %v4285_v14 = vadd.f32 %v4281_v18, %v1923_v37 }
 0x33f   : > { %v1618_v46 = vadd.f32 1.0, %v3079_v55  ;;  %3082 = vrcp.f32 %v1617_v8  ;;  %v1896_v34 = vadd.f32 %v1888_v36, %v1868_v21  ;;  %v1757_v48 = vadd.f32 %v1749_v27, %v1729_v61 }
 0x340   : > { %3084 = vrcp.f32 %v1620_v16  ;;  %v1869_v43 = vadd.f32 %v1861_v13, %v1840_v47  ;;  %v2727_v54 = vmul.f32 -1.442695, %v4285_v14  ;;  %v1917_v52 = vmul.f32 %v4271_v38, %v1738_v3 }
 0x341   : > { %3086 = vrcp.f32 %v1618_v46  ;;  %v1924_v2 = vadd.f32 %v1916_v9, %v1896_v34  ;;  %v1777_v55 = vmul.f32 %v4234_v25, %v1682_v17  ;;  %v1750_v57 = vmul.f32 %v4217_v7, %v1738_v3 }
 0x342   : > { %v1897_v29 = vadd.f32 %v1889_v28, %v1869_v43  ;;  %3088 = vpow2.f32 %v2727_v54  ;;  %v1833_v51 = vmul.f32 %v4244_v10, %v1738_v3 }
 0x343   : > { %v1785_v58 = vadd.f32 %v1777_v55, %v1757_v48  ;;  %v4298_v4 = vadd.f32 %v4281_v18, %v1924_v2 }
 0x344   : > { %v1925_v31 = vadd.f32 %v1917_v52, %v1897_v29 }
 0x345   : > { %v2728_v46 = vmul.f32 -1.442695, %v4298_v4 }
 0x346   : > { %v4303_v16 = vadd.f32 %v4281_v18, %v1925_v31 }
 0x347   : > { %3090 = vpow2.f32 %v2728_v46 }
 0x348   : > { %v3081_v40 = vpop.eup %3080  ;;  %v2729_v49 = vmul.f32 -1.442695, %v4303_v16 }
 0x349   : > { %v3083_v41 = vpop.eup %3082  ;;  %v1643_v56 = vmul.f32 %v3081_v40, %v4209_v23  ;;  %v1805_v23 = vmul.f32 %v4238_v44, %v1710_v63 }
 0x34a   : > { %v3085_v32 = vpop.eup %3084  ;;  %v1641_v12 = vmul.f32 %v3083_v41, %v4211_v62  ;;  %v1730_v62 = vadd.f32 %v1722_v53, %v1694_v42  ;;  %3092 = vpow2.f32 %v2729_v49 }
 0x34b   : > { %v3087_v0 = vpop.eup %3086  ;;  %1674 = vst.msk [vmem:[#allocation2 + $0x71] sm:$0xff] %vm1645_vm12, %v1643_v56  ;;  %v1644_v8 = vmul.f32 %v3085_v32, %v4213_v60  ;;  %v1813_v24 = vadd.f32 %v1805_v23, %v1785_v58  ;;  %v1910_v60 = vld [vmem:[#allocation2 + $0x92] sm:$0xff] }
 0x34c   : > { %1672 = vst.msk [vmem:[#allocation2 + $0x51] sm:$0xff] %vm1645_vm12, %v1641_v12  ;;  %v1642_v50 = vmul.f32 %v3087_v0, %v4220_v33  ;;  %v3089_v6 = vpop.eup %3088  ;;  %v4315_v33 = vmul.f32 %v4251_v11, %v1854_v19  ;;  %v1758_v26 = vadd.f32 %v1750_v57, %v1730_v62  ;;  %v4325_v21 = vmul.f32 %v4271_v38, %v1910_v60 }
 0x34d   : > { %1675 = vst.msk [vmem:[#allocation2 + $0x81] sm:$0xff] %vm1645_vm12, %v1644_v8  ;;  %v1841_v30 = vadd.f32 %v1833_v51, %v1813_v24  ;;  %v4330_v34 = vadd.f32 1.0, %v3089_v6 }
 0x34e   : > { %1673 = vst.msk [vmem:[#allocation2 + $0x61] sm:$0xff] %vm1645_vm12, %v1642_v50 }
 0x34f   : > { %3094 = vrcp.f32 %v4330_v34 }
 0x352   : > { %v1685_v45 = vld [vmem:[#allocation2 + $0x70] sm:$0xff] }
 0x353   : > { %v4320_v36 = vld [vmem:[#allocation2 + $0x71] sm:$0xff]  ;;  %v1697_v37 = vmul.f32 %v4204_v22, %v1685_v45  ;;  %v1780_v54 = vmul.f32 %v4234_v25, %v1685_v45 }
 0x354   : > { %v4322_v17 = vld [vmem:[#allocation2 + $0x72] sm:$0xff]  ;;  %v1725_v61 = vmul.f32 %v4207_v59, %v4320_v36  ;;  %v1769_v43 = vld [vmem:[#allocation2 + $0x80] sm:$0xff] }
 0x355   : > { %v1683_v63 = vld [vmem:[#allocation2 + $0x50] sm:$0xff]  ;;  %v1753_v27 = vmul.f32 %v4217_v7, %v4322_v17  ;;  %v1684_v29 = vld [vmem:[#allocation2 + $0x60] sm:$0xff]  ;;  %v1781_v62 = vmul.f32 %v4234_v25, %v1769_v43  ;;  %v1836_v57 = vmul.f32 %v4244_v10, %v4322_v17 }
 0x356   : > { %v1711_v13 = vld [vmem:[#allocation2 + $0x51] sm:$0xff]  ;;  %v1695_v9 = vmul.f32 %v4204_v22, %v1683_v63  ;;  %v1778_v28 = vmul.f32 %v4234_v25, %v1683_v63  ;;  %v1712_v52 = vld [vmem:[#allocation2 + $0x61] sm:$0xff]  ;;  %v1733_v55 = vadd.f32 %v1725_v61, %v1697_v37  ;;  %v1696_v56 = vmul.f32 %v4204_v22, %v1684_v29 }
 0x357   : > { %v1739_v47 = vld [vmem:[#allocation2 + $0x52] sm:$0xff]  ;;  %v1723_v3 = vmul.f32 %v4207_v59, %v1711_v13  ;;  %v1806_v2 = vmul.f32 %v4238_v44, %v1711_v13  ;;  %v1740_v40 = vld [vmem:[#allocation2 + $0x62] sm:$0xff]  ;;  %v1724_v31 = vmul.f32 %v4207_v59, %v1712_v52  ;;  %v1862_v58 = vmul.f32 %v4251_v11, %v1683_v63 }
 0x358   : > { %v1751_v48 = vmul.f32 %v4217_v7, %v1739_v47  ;;  %v1786_v42 = vadd.f32 %v1778_v28, %v1758_v26  ;;  %v1797_v32 = vld [vmem:[#allocation2 + $0x81] sm:$0xff]  ;;  %v1834_v53 = vmul.f32 %v4244_v10, %v1739_v47  ;;  %v1752_v12 = vmul.f32 %v4217_v7, %v1740_v40  ;;  %v3091_v26 = vpop.eup %3090 }
 0x359   : > { %v1731_v41 = vadd.f32 %v1723_v3, %v1695_v9  ;;  %v1761_v0 = vadd.f32 %v1753_v27, %v1733_v55  ;;  %v1732_v23 = vadd.f32 %v1724_v31, %v1696_v56  ;;  %v1779_v50 = vmul.f32 %v4234_v25, %v1684_v29  ;;  %v1825_v24 = vld [vmem:[#allocation2 + $0x82] sm:$0xff] }
 0x35a   : > { %v1807_v19 = vmul.f32 %v4238_v44, %v1712_v52  ;;  %v1808_v22 = vmul.f32 %v4238_v44, %v4320_v36  ;;  %v1809_v59 = vmul.f32 %v4238_v44, %v1797_v32  ;;  %v1814_v1 = vadd.f32 %v1806_v2, %v1786_v42  ;;  %v3093_v44 = vpop.eup %3092 }
 0x35b   : > { %v1759_v8 = vadd.f32 %v1751_v48, %v1731_v41  ;;  %v1760_v46 = vadd.f32 %v1752_v12, %v1732_v23  ;;  %v1789_v49 = vadd.f32 %v1781_v62, %v1761_v0  ;;  %v1835_v7 = vmul.f32 %v4244_v10, %v1740_v40 }
 0x35c   : > { %v1837_v51 = vmul.f32 %v4244_v10, %v1825_v24  ;;  %v1842_v25 = vadd.f32 %v1834_v53, %v1814_v1  ;;  %v1863_v6 = vmul.f32 %v4251_v11, %v1684_v29  ;;  %v1870_v27 = vadd.f32 %v1862_v58, %v1841_v30 }
 0x35d   : > { %v1787_v60 = vadd.f32 %v1779_v50, %v1759_v8  ;;  %v1788_v37 = vadd.f32 %v1780_v54, %v1760_v46  ;;  %v1817_v63 = vadd.f32 %v1809_v59, %v1789_v49  ;;  %v1864_v9 = vmul.f32 %v4251_v11, %v1685_v45 }
 0x35e   : > { %v1871_v3 = vadd.f32 %v1863_v6, %v1842_v25  ;;  %v1890_v28 = vmul.f32 %v4254_v20, %v1711_v13  ;;  %v1891_v48 = vmul.f32 %v4254_v20, %v1712_v52  ;;  %v1865_v10 = vmul.f32 %v4251_v11, %v1769_v43 }
 0x35f   : > { %v1815_v61 = vadd.f32 %v1807_v19, %v1787_v60  ;;  %v1816_v2 = vadd.f32 %v1808_v22, %v1788_v37  ;;  %v1845_v41 = vadd.f32 %v1837_v51, %v1817_v63  ;;  %v1918_v54 = vmul.f32 %v4271_v38, %v1739_v47 }
 0x360   : > { %v1898_v42 = vadd.f32 %v1890_v28, %v1870_v27  ;;  %v1899_v29 = vadd.f32 %v1891_v48, %v1871_v3  ;;  %v1919_v56 = vmul.f32 %v4271_v38, %v1740_v40  ;;  %v1892_v13 = vmul.f32 %v4254_v20, %v4320_v36 }
 0x361   : > { %v1843_v55 = vadd.f32 %v1835_v7, %v1815_v61  ;;  %v1844_v30 = vadd.f32 %v1836_v57, %v1816_v2  ;;  %v1874_v45 = vadd.f32 %v4315_v33, %v1845_v41  ;;  %v1893_v52 = vmul.f32 %v4254_v20, %v1797_v32 }
 0x362   : > { %v1920_v53 = vmul.f32 %v4271_v38, %v4322_v17  ;;  %v1926_v58 = vadd.f32 %v1918_v54, %v1898_v42  ;;  %v1927_v11 = vadd.f32 %v1919_v56, %v1899_v29  ;;  %v1971_v0 = vadd.f32 1.0, %v3091_v26 }
 0x363   : > { %v1872_v31 = vadd.f32 %v1864_v9, %v1843_v55  ;;  %v1873_v43 = vadd.f32 %v1865_v10, %v1844_v30  ;;  %v1902_v47 = vadd.f32 %v4318_v35, %v1874_v45  ;;  %v1921_v23 = vmul.f32 %v4271_v38, %v1825_v24  ;;  %v3095_v24 = vpop.eup %3094 }
 0x364   : > { %v1941_v40 = vadd.f32 %v4281_v18, %v1926_v58  ;;  %v1942_v8 = vadd.f32 %v4281_v18, %v1927_v11  ;;  %v1972_v17 = vadd.f32 1.0, %v3093_v44  ;;  %3096 = vrcp.f32 %v1971_v0 }
 0x365   : > { %v1900_v12 = vadd.f32 %v1892_v13, %v1872_v31  ;;  %v1901_v33 = vadd.f32 %v1893_v52, %v1873_v43  ;;  %v1930_v20 = vadd.f32 %v4325_v21, %v1902_v47  ;;  %v4381_v61 = vmul.f32 %v3095_v24, %v4285_v14 }
 0x366   : > { %v2730_v32 = vmul.f32 -1.442695, %v1941_v40  ;;  %v2731_v50 = vmul.f32 -1.442695, %v1942_v8 }
 0x367   : > { %v1928_v36 = vadd.f32 %v1920_v53, %v1900_v12  ;;  %v1929_v62 = vadd.f32 %v1921_v23, %v1901_v33  ;;  %v1945_v35 = vadd.f32 %v4281_v18, %v1930_v20  ;;  %v2002_v44 = vsel %vm1645_vm12, %v4381_v61, 0.0 }
 0x368   : > { %3098 = vpow2.f32 %v2730_v32 }
 0x369   : > { %v1943_v19 = vadd.f32 %v4281_v18, %v1928_v36  ;;  %v1944_v22 = vadd.f32 %v4281_v18, %v1929_v62  ;;  %3100 = vpow2.f32 %v2731_v50  ;;  %v2734_v38 = vmul.f32 -1.442695, %v1945_v35  ;;  %v2082_v36 = vld [vmem:[%s4628_s9] sm:$0xff] }
 0x36a   : > { %3102 = vrcp.f32 %v1972_v17  ;;  %v2084_v20 = vpack.c.bf16 %v2082_v36, %v2082_v36  ;;  %v2031_v50 = vld [vmem:[%s4627_s8] sm:$0x1] }
 0x36b   : > { %v2732_v59 = vmul.f32 -1.442695, %v1943_v19  ;;  %v2733_v21 = vmul.f32 -1.442695, %v1944_v22 }
 0x36c   : > { %v2092_v32 = vsel %vm2090_vm15, %v2084_v20, 0 }
 0x36d   : > { %3104 = vpow2.f32 %v2732_v59  ;;  %2842 = vmatpush3.bf16.msra.mxu0 %v2092_v32 }
 0x36e   : > { %3106 = vpow2.f32 %v2734_v38  ;;  %v3097_v1 = vpop.eup %3096 }
 0x36f   : > { %3108 = vpow2.f32 %v2733_v21  ;;  %v4378_v18 = vmul.f32 %v3097_v1, %v4298_v4 }
 0x371   : > { %v2003_v27 = vsel %vm1645_vm12, %v4378_v18, 0.0 }
 0x372   : > { %v3099_v34 = vpop.eup %3098  ;;  %v2004_v4 = vadd.f32 %v2003_v27, %v2002_v44 }
 0x373   : > { %v3101_v46 = vpop.eup %3100  ;;  %v1973_v60 = vadd.f32 1.0, %v3099_v34 }
 0x374   : > { %v3103_v49 = vpop.eup %3102  ;;  %v1974_v7 = vadd.f32 1.0, %v3101_v46  ;;  %v2152_v46 = vld [vmem:[%s4630_s11] sm:$0xff] }
 0x375   : > { %3110 = vrcp.f32 %v1973_v60  ;;  %v4384_v63 = vmul.f32 %v3103_v49, %v4303_v16  ;;  %v2153_v60 = vld [vmem:[%s4630_s11 + $0x8] sm:$0xff]  ;;  %v2154_v49 = vld [vmem:[%s4630_s11 + $0x10] sm:$0xff] }
 0x376   : > { %3112 = vrcp.f32 %v1974_v7  ;;  %v2160_v7 = vpack.c.bf16 %v2153_v60, %v2152_v46  ;;  %v2483_v46 = vld [vmem:[%s4634_s15 + $0x28] sm:$0xff]  ;;  %v2535_v60 = vld [vmem:[%s4636_s17] sm:$0xff] }
 0x377   : > { %v3105_v57 = vpop.eup %3104  ;;  %v2005_v9 = vsel %vm1645_vm12, %v4384_v63, 0.0 }
 0x378   : > { %v3107_v51 = vpop.eup %3106  ;;  %v1975_v25 = vadd.f32 1.0, %v3105_v57  ;;  %v2006_v2 = vadd.f32 %v2005_v9, %v2004_v4  ;;  %v2155_v57 = vld [vmem:[%s4630_s11 + $0x18] sm:$0xff]  ;;  %2847 = vmatprep.subr.bf16.mxu1 %v2160_v7 }
 0x379   : > { %v3109_v6 = vpop.eup %3108  ;;  %v1977_v26 = vadd.f32 1.0, %v3107_v51  ;;  %v2161_v51 = vpack.c.bf16 %v2155_v57, %v2154_v49  ;;  %v2536_v49 = vld [vmem:[%s4636_s17 + $0x8] sm:$0xff] }
 0x37a   : > { %v1976_v37 = vadd.f32 1.0, %v3109_v6  ;;  %3114 = vrcp.f32 %v1975_v25  ;;  %v2085_v25 = vld [vmem:[%s4629_s10] sm:$0x1] }
 0x37b   : > { %3116 = vrcp.f32 %v1977_v26 }
 0x37c   : > { %3118 = vrcp.f32 %v1976_v37 }
 0x37f   : > { %v3111_v3 = vpop.eup %3110 }
 0x380   : > { %v3113_v28 = vpop.eup %3112  ;;  %v4392_v48 = vmul.f32 %v3111_v3, %v1941_v40 }
 0x381   : > { %v4394_v14 = vmul.f32 %v3113_v28, %v1942_v8 }
 0x382   : > { %v2007_v16 = vsel %vm1645_vm12, %v4392_v48, 0.0 }
 0x383   : > { %v2008_v42 = vadd.f32 %v2007_v16, %v2006_v2  ;;  %v2009_v29 = vsel %vm1645_vm12, %v4394_v14, 0.0 }
 0x384   : > { %v3115_v55 = vpop.eup %3114 }
 0x385   : > { %v3117_v41 = vpop.eup %3116  ;;  %v4398_v10 = vmul.f32 %v3115_v55, %v1943_v19  ;;  %v2010_v30 = vadd.f32 %v2009_v29, %v2008_v42 }
 0x386   : > { %v3119_v54 = vpop.eup %3118  ;;  %v4406_v45 = vmul.f32 %v3117_v41, %v1945_v35 }
 0x387   : > { %v4402_v56 = vmul.f32 %v3119_v54, %v1944_v22  ;;  %v2011_v31 = vsel %vm1645_vm12, %v4398_v10, 0.0 }
 0x388   : > { %v2012_v13 = vadd.f32 %v2011_v31, %v2010_v30  ;;  %v2015_v58 = vsel %vm1645_vm12, %v4406_v45, 0.0 }
 0x389   : > { %v2013_v52 = vsel %vm1645_vm12, %v4402_v56, 0.0 }
 0x38a   : > { %v2014_v53 = vadd.f32 %v2013_v52, %v2012_v13  ;;  %v2739_v52 = vld [vmem:[%s4631_s12] ss:$0 sm:$0xff] }
 0x38c   : > { %v2016_v11 = vadd.f32 %v2015_v58, %v2014_v53 }
 0x38e   : > { %v2017_v43 = vrot.slane %v2016_v11, 4 }
 0x390   : > { %v2018_v12 = vadd.f32 %v2017_v43, %v2016_v11 }
 0x392   : > { %v2019_v47 = vrot.slane %v2018_v12, 2 }
 0x394   : > { %v2020_v0 = vadd.f32 %v2019_v47, %v2018_v12 }
 0x396   : > { %v2021_v40 = vrot.slane %v2020_v0, 1 }
 0x398   : > { %v2022_v8 = vadd.f32 %v2021_v40, %v2020_v0 }
 0x39a   : > { %v2023_v33 = vmul.f32 0.015625, %v2022_v8 }
 0x39c   : > { %v2028_v23 = vpack.c.bf16 %v2023_v33, %v2023_v33 }
 0x39e   : > { %2838 = vmatmul.mubr.msk.bf16.vlgmr.msra.gmra.mrb[12].mxu1 %vm1645_vm12, %v2028_v23 }
 0x39f   : > { %2848 = vmatpush3.bf16.msra.mxu1 %v2160_v7  ;;  %v2537_v7 = vld [vmem:[%s4636_s17 + $0x10] sm:$0xff] }
 0x3a0   : > { %2849 = vmatprep.subr.bf16.mxu1 %v2161_v51 }
 0x3a3   : > { %2850 = vmatpush3.bf16.msra.mxu1 %v2161_v51  ;;  %v2552_v51 = vpack.c.bf16 %v2536_v49, %v2535_v60 }
 0x3a4   : > { %2871 = vmatprep.subr.bf16.mxu1 %v3262_v5 }
 0x471   : > { %v2069_v17 = vpop.f32.mrb[12].mxu1 }
 0x472   : > { %v2070_v62 = vadd.f32 %v2069_v17, %v2031_v50  ;;  %v2839_v19 = vpop.f32.mrb[13].mxu1 }
 0x473   : > { %v2072_v35 = vpop.f32.mrb[14].mxu1 }
 0x474   : > { %v2736_v22 = vmul.f32 -1.442695, %v2070_v62  ;;  %v2840_v59 = vpop.f32.mrb[15].mxu1 }
 0x475   : > { %v2479_v59 = vld [vmem:[%s4634_s15 + $0x8] sm:$0xff] }
 0x476   : > { %3120 = vpow2.f32 %v2736_v22  ;;  %v2478_v22 = vld [vmem:[%s4634_s15] sm:$0xff] }
 0x480   : > { %v3121_v38 = vpop.eup %3120 }
 0x481   : > { %v2078_v21 = vadd.f32 1.0, %v3121_v38  ;;  %v2480_v38 = vld [vmem:[%s4634_s15 + $0x10] sm:$0xff] }
 0x483   : > { %3122 = vrcp.f32 %v2078_v21  ;;  %v2487_v21 = vpack.c.bf16 %v2479_v59, %v2478_v22 }
 0x48d   : > { %v3123_v24 = vpop.eup %3122 }
 0x48e   : > { %v2081_v1 = vmul.f32 %v3123_v24, %v2070_v62  ;;  %v2481_v24 = vld [vmem:[%s4634_s15 + $0x18] sm:$0xff] }
 0x490   : > { %v2083_v34 = vpack.c.bf16 %v2081_v1, %v2081_v1  ;;  %v2488_v1 = vpack.c.bf16 %v2481_v24, %v2480_v38 }
 0x492   : > { %2844 = vmatmul.mubr.msk.bf16.vlgmr.msra.gmra.mrb[4].mxu0 %vm2086_vm0, %v2083_v34  ;;  %v2482_v34 = vld [vmem:[%s4634_s15 + $0x20] sm:$0xff] }
 0x493   : > { %v2489_v57 = vpack.c.bf16 %v2483_v46, %v2482_v34 }
 0x565   : > { %v2128_v6 = vpop.f32.mrb[4].mxu0 }
 0x566   : > { %v2129_v26 = vadd.f32 %v2128_v6, %v2085_v25  ;;  %v2845_v37 = vpop.f32.mrb[5].mxu0  ;;  %v2538_v25 = vld [vmem:[%s4636_s17 + $0x18] sm:$0xff]  ;;  %v2484_v6 = vld [vmem:[%s4634_s15 + $0x30] sm:$0xff] }
 0x567   : > { %v2131_v27 = vpop.f32.mrb[6].mxu0  ;;  %v2553_v37 = vpack.c.bf16 %v2538_v25, %v2537_v7 }
 0x568   : > { %v2738_v44 = vmul.f32 -1.442695, %v2129_v26  ;;  %v2846_v4 = vpop.f32.mrb[7].mxu0  ;;  %v2485_v26 = vld [vmem:[%s4634_s15 + $0x38] sm:$0xff]  ;;  %v2539_v27 = vld [vmem:[%s4636_s17 + $0x20] sm:$0xff] }
 0x569   : > { %v2490_v4 = vpack.c.bf16 %v2485_v26, %v2484_v6 }
 0x56a   : > { %3124 = vpow2.f32 %v2738_v44  ;;  %v2540_v44 = vld [vmem:[%s4636_s17 + $0x28] sm:$0xff] }
 0x574   : > { %v3125_v9 = vpop.eup %3124 }
 0x575   : > { %v2137_v3 = vadd.f32 1.0, %v3125_v9  ;;  %v2554_v9 = vpack.c.bf16 %v2540_v44, %v2539_v27 }
 0x577   : > { %3126 = vrcp.f32 %v2137_v3  ;;  %v2541_v3 = vld [vmem:[%s4636_s17 + $0x30] sm:$0xff] }
 0x581   : > { %v3127_v28 = vpop.eup %3126 }
 0x582   : > { %v2143_v2 = vrot.slane %v3127_v28, %v1688_v39  ;;  %v2542_v28 = vld [vmem:[%s4636_s17 + $0x38] sm:$0xff] }
 0x584   : > { %v2144_v55 = vmul.f32 %v2143_v2, %v4381_v61  ;;  %v2145_v16 = vmul.f32 %v2143_v2, %v4378_v18  ;;  %v2146_v41 = vmul.f32 %v2143_v2, %v4384_v63  ;;  %v2147_v42 = vmul.f32 %v2143_v2, %v4392_v48  ;;  %v2246_v61 = vld [vmem:[%s4632_s13] sm:$0xff]  ;;  %v2247_v63 = vld [vmem:[%s4632_s13 + $0x8] sm:$0xff] }
 0x585   : > { %v2148_v29 = vmul.f32 %v2143_v2, %v4394_v14  ;;  %v2149_v54 = vmul.f32 %v2143_v2, %v4398_v10  ;;  %v2150_v15 = vmul.f32 %v2143_v2, %v4402_v56  ;;  %v2151_v39 = vmul.f32 %v2143_v2, %v4406_v45  ;;  %v2248_v14 = vld [vmem:[%s4632_s13 + $0x10] sm:$0xff] }
 0x586   : > { %v2156_v30 = vpack.c.bf16 %v2145_v16, %v2144_v55  ;;  %v2157_v31 = vpack.c.bf16 %v2147_v42, %v2146_v41  ;;  %v2253_v48 = vpack.c.bf16 %v2247_v63, %v2246_v61  ;;  %v2254_v10 = vpack.c.bf16 %v2248_v14, %v2248_v14  ;;  %v2543_v55 = vld [vmem:[%s4636_s17 + $0x40] sm:$0xff]  ;;  %v2544_v16 = vld [vmem:[%s4636_s17 + $0x48] sm:$0xff]  ;;  %v2545_v42 = vld [vmem:[%s4636_s17 + $0x50] sm:$0xff] }
 0x587   : > { %v2158_v13 = vpack.c.bf16 %v2149_v54, %v2148_v29  ;;  %v2159_v18 = vpack.c.bf16 %v2151_v39, %v2150_v15  ;;  %v2555_v2 = vpack.c.bf16 %v2542_v28, %v2541_v3  ;;  %v2556_v41 = vpack.c.bf16 %v2544_v16, %v2543_v55  ;;  %v2546_v29 = vld [vmem:[%s4636_s17 + $0x58] sm:$0xff]  ;;  %v2744_v15 = vld [vmem:[%s4633_s14] ss:$0 sm:$0xff] }
 0x588   : > { %2851 = vmatprep.mubr.msk.bf16.mxu1 %vm1645_vm12, %v2156_v30  ;;  %2859 = vmatprep.subr.bf16.mxu0 %v2253_v48  ;;  %v2276_v56 = vsel %vm2090_vm15, %v2254_v10, 0  ;;  %v2557_v54 = vpack.c.bf16 %v2546_v29, %v2545_v42  ;;  %v2547_v30 = vld [vmem:[%s4636_s17 + $0x60] sm:$0xff] }
 0x589   : > { %2852 = vmatmul.mubr.msk.bf16.vlgmr.msra.gmra.mrb[16].mxu1 %vm1645_vm12, %v2157_v31  ;;  %2860 = vmatpush3.bf16.msra.mxu0 %v2253_v48  ;;  %v2548_v31 = vld [vmem:[%s4636_s17 + $0x68] sm:$0xff] }
 0x58a   : > { %2855 = vmatprep.mubr.msk.bf16.mxu1 %vm1645_vm12, %v2158_v13  ;;  %2907 = vmatprep.subr.msk.bf16.mxu0 %vm2090_vm15, %v2254_v10  ;;  %v2558_v13 = vpack.c.bf16 %v2548_v31, %v2547_v30 }
 0x58b   : > { %2872 = vmatpush3.bf16.msra.mxu1 %v2487_v21 }
 0x58c   : > { %2873 = vmatprep.subr.bf16.mxu1 %v3262_v5 }
 0x58d   : > { %2862 = vmatpush3.bf16.msra.mxu0 %v2276_v56 }
 0x58e   : > { %2883 = vmatprep.subr.bf16.mxu0 %v3262_v5 }
 0x58f   : > { %2874 = vmatpush3.bf16.msra.mxu1 %v2488_v1 }
 0x590   : > { %2875 = vmatprep.subr.bf16.mxu1 %v3262_v5 }
 0x591   : > { %2856 = vmatmul.mubr.msk.bf16.gmra.mrb[20].mxu1 %vm1645_vm12, %v2159_v18 }
 0x592   : > { %2879 = vmatprep.mubr.msk.bf16.mxu1 %vm3263_vm14, %v3262_v5 }
 0x593   : > { %2876 = vmatpush3.bf16.msra.mxu1 %v2489_v57 }
 0x594   : > { %2877 = vmatprep.subr.bf16.mxu1 %v3262_v5 }
 0x597   : > { %2878 = vmatpush3.bf16.msra.mxu1 %v2490_v4 }
 0x65c   : > { %v2853_v45 = vpop.f32.mrb[16].mxu1 }
 0x65d   : > { %v2215_v53 = vpop.f32.mrb[17].mxu1  ;;  %v2224_v11 = vadd.f32 %v2853_v45, %v2739_v52 }
 0x65e   : > { %v2854_v58 = vpop.f32.mrb[18].mxu1  ;;  %v2216_v47 = vadd.f32 %v2739_v52, %v2215_v53 }
 0x65f   : > { %v2227_v43 = vadd.f32 %v2854_v58, %v2739_v52  ;;  %v2218_v12 = vpop.f32.mrb[19].mxu1 }
 0x660   : > { %v2219_v0 = vadd.f32 %v2739_v52, %v2218_v12 }
 0x661   : > { %v2250_v40 = vpack.c.bf16 %v2227_v43, %v2224_v11 }
 0x662   : > { %v2249_v8 = vpack.c.bf16 %v2219_v0, %v2216_v47 }
 0x664   : > { %v2857_v33 = vpop.f32.mrb[20].mxu1  ;;  %2863 = vmatprep.mubr.msk.bf16.mxu0 %vm2262_vm1, %v2249_v8 }
 0x665   : > { %v2231_v23 = vpop.f32.mrb[21].mxu1  ;;  %2864 = vmatmul.mubr.msk.bf16.vlgmr.msra.gmra.mrb[8].mxu0 %vm2262_vm1, %v2250_v40  ;;  %v2240_v20 = vadd.f32 %v2857_v33, %v2739_v52 }
 0x666   : > { %v2858_v36 = vpop.f32.mrb[22].mxu1  ;;  %v2232_v17 = vadd.f32 %v2739_v52, %v2231_v23  ;;  %2884 = vmatpush3.bf16.msra.mxu0 %v2552_v51 }
 0x667   : > { %v2243_v32 = vadd.f32 %v2858_v36, %v2739_v52  ;;  %v2234_v50 = vpop.f32.mrb[23].mxu1  ;;  %2885 = vmatprep.subr.bf16.mxu0 %v3262_v5 }
 0x668   : > { %v2235_v62 = vadd.f32 %v2739_v52, %v2234_v50 }
 0x669   : > { %v2252_v19 = vpack.c.bf16 %v2243_v32, %v2240_v20 }
 0x66a   : > { %v2251_v35 = vpack.c.bf16 %v2235_v62, %v2232_v17  ;;  %2886 = vmatpush3.bf16.msra.mxu0 %v2553_v37 }
 0x66b   : > { %2887 = vmatprep.subr.bf16.mxu0 %v3262_v5 }
 0x66c   : > { %2867 = vmatprep.mubr.msk.bf16.mxu0 %vm2262_vm1, %v2251_v35 }
 0x66d   : > { %2868 = vmatmul.mubr.msk.bf16.gmra.mrb[12].mxu0 %vm2262_vm1, %v2252_v19 }
 0x66e   : > { %2899 = vmatprep.mubr.msk.bf16.mxu0 %vm3263_vm14, %v3262_v5  ;;  %2888 = vmatpush3.bf16.msra.mxu0 %v2554_v9 }
 0x66f   : > { %2889 = vmatprep.subr.bf16.mxu0 %v3262_v5 }
 0x672   : > { %2890 = vmatpush3.bf16.msra.mxu0 %v2555_v2 }
 0x673   : > { %2891 = vmatprep.subr.bf16.mxu0 %v3262_v5 }
 0x676   : > { %2892 = vmatpush3.bf16.msra.mxu0 %v2556_v41 }
 0x677   : > { %2893 = vmatprep.subr.bf16.mxu0 %v3262_v5 }
 0x67a   : > { %2894 = vmatpush3.bf16.msra.mxu0 %v2557_v54 }
 0x67b   : > { %2895 = vmatprep.subr.bf16.mxu0 %v3262_v5 }
 0x67e   : > { %2896 = vmatpush3.bf16.msra.mxu0 %v2558_v13 }
 0x67f   : > { %2897 = vmatprep.subr.bf16.mxu0 %v3262_v5 }
 0x738   : > { %v2865_v39 = vpop.f32.mrb[8].mxu0 }
 0x739   : > { %v2321_v18 = vadd.f32 %v2865_v39, %v2744_v15  ;;  %v2312_v61 = vpop.f32.mrb[9].mxu0 }
 0x73a   : > { %v2313_v63 = vadd.f32 %v2744_v15, %v2312_v61  ;;  %v2866_v48 = vpop.f32.mrb[10].mxu0 }
 0x73b   : > { %v2751_v14 = vmul.f32 -1.442695, %v2321_v18  ;;  %v2324_v10 = vadd.f32 %v2866_v48, %v2744_v15  ;;  %v2315_v56 = vpop.f32.mrb[11].mxu0 }
 0x73c   : > { %v2749_v45 = vmul.f32 -1.442695, %v2313_v63  ;;  %v2316_v52 = vadd.f32 %v2744_v15, %v2315_v56 }
 0x73d   : > { %3128 = vpow2.f32 %v2751_v14  ;;  %v2752_v53 = vmul.f32 -1.442695, %v2324_v10 }
 0x73e   : > { %3130 = vpow2.f32 %v2749_v45  ;;  %v2750_v58 = vmul.f32 -1.442695, %v2316_v52 }
 0x73f   : > { %3132 = vpow2.f32 %v2752_v53 }
 0x740   : > { %3134 = vpow2.f32 %v2750_v58  ;;  %v2869_v5 = vpop.f32.mrb[12].mxu0 }
 0x741   : > { %v2337_v11 = vadd.f32 %v2869_v5, %v2744_v15  ;;  %v2328_v43 = vpop.f32.mrb[13].mxu0 }
 0x742   : > { %v2329_v12 = vadd.f32 %v2744_v15, %v2328_v43  ;;  %v2870_v47 = vpop.f32.mrb[14].mxu0 }
 0x743   : > { %v2755_v0 = vmul.f32 -1.442695, %v2337_v11  ;;  %v2340_v40 = vadd.f32 %v2870_v47, %v2744_v15  ;;  %v2331_v8 = vpop.f32.mrb[15].mxu0 }
 0x744   : > { %v2753_v33 = vmul.f32 -1.442695, %v2329_v12  ;;  %v2332_v23 = vadd.f32 %v2744_v15, %v2331_v8 }
 0x745   : > { %3136 = vpow2.f32 %v2755_v0  ;;  %v2756_v36 = vmul.f32 -1.442695, %v2340_v40 }
 0x746   : > { %3138 = vpow2.f32 %v2753_v33  ;;  %v2754_v20 = vmul.f32 -1.442695, %v2332_v23 }
 0x747   : > { %v3129_v32 = vpop.eup %3128  ;;  %3140 = vpow2.f32 %v2756_v36 }
 0x748   : > { %v3131_v50 = vpop.eup %3130  ;;  %v2369_v17 = vadd.f32 1.0, %v3129_v32  ;;  %3142 = vpow2.f32 %v2754_v20 }
 0x749   : > { %v3133_v62 = vpop.eup %3132  ;;  %v2367_v19 = vadd.f32 1.0, %v3131_v50 }
 0x74a   : > { %v3135_v35 = vpop.eup %3134  ;;  %3144 = vrcp.f32 %v2369_v17  ;;  %v2370_v22 = vadd.f32 1.0, %v3133_v62 }
 0x74b   : > { %3146 = vrcp.f32 %v2367_v19  ;;  %v2368_v59 = vadd.f32 1.0, %v3135_v35 }
 0x74c   : > { %3148 = vrcp.f32 %v2370_v22 }
 0x74d   : > { %3150 = vrcp.f32 %v2368_v59 }
 0x74f   : > { %v3137_v38 = vpop.eup %3136 }
 0x750   : > { %v3139_v21 = vpop.eup %3138  ;;  %v2373_v24 = vadd.f32 1.0, %v3137_v38 }
 0x751   : > { %v3141_v1 = vpop.eup %3140  ;;  %v2371_v34 = vadd.f32 1.0, %v3139_v21 }
 0x752   : > { %v3143_v46 = vpop.eup %3142  ;;  %3152 = vrcp.f32 %v2373_v24  ;;  %v2374_v60 = vadd.f32 1.0, %v3141_v1 }
 0x753   : > { %3154 = vrcp.f32 %v2371_v34  ;;  %v2372_v49 = vadd.f32 1.0, %v3143_v46 }
 0x754   : > { %v3145_v7 = vpop.eup %3144  ;;  %3156 = vrcp.f32 %v2374_v60 }
 0x755   : > { %v3147_v57 = vpop.eup %3146  ;;  %v2393_v51 = vmul.f32 %v3145_v7, %v2321_v18  ;;  %3158 = vrcp.f32 %v2372_v49 }
 0x756   : > { %v3149_v25 = vpop.eup %3148  ;;  %v2391_v6 = vmul.f32 %v3147_v57, %v2313_v63 }
 0x757   : > { %v3151_v26 = vpop.eup %3150  ;;  %v2759_v37 = vmul.f32 -1.442695, %v2393_v51  ;;  %v2394_v27 = vmul.f32 %v3149_v25, %v2324_v10 }
 0x758   : > { %v2757_v44 = vmul.f32 -1.442695, %v2391_v6  ;;  %v2392_v4 = vmul.f32 %v3151_v26, %v2316_v52 }
 0x759   : > { %3160 = vpow2.f32 %v2759_v37  ;;  %v2760_v9 = vmul.f32 -1.442695, %v2394_v27 }
 0x75a   : > { %3162 = vpow2.f32 %v2757_v44  ;;  %v2758_v3 = vmul.f32 -1.442695, %v2392_v4 }
 0x75b   : > { %3164 = vpow2.f32 %v2760_v9 }
 0x75c   : > { %v3153_v28 = vpop.eup %3152  ;;  %3166 = vpow2.f32 %v2758_v3 }
 0x75d   : > { %v3155_v2 = vpop.eup %3154  ;;  %v2397_v55 = vmul.f32 %v3153_v28, %v2337_v11 }
 0x75e   : > { %v3157_v16 = vpop.eup %3156  ;;  %v2395_v41 = vmul.f32 %v3155_v2, %v2329_v12 }
 0x75f   : > { %v3159_v42 = vpop.eup %3158  ;;  %v2763_v29 = vmul.f32 -1.442695, %v2397_v55  ;;  %v2398_v54 = vmul.f32 %v3157_v16, %v2340_v40  ;;  %v2549_v16 = vld [vmem:[%s4636_s17 + $0x70] sm:$0xff] }
 0x760   : > { %v2761_v30 = vmul.f32 -1.442695, %v2395_v41  ;;  %v2396_v31 = vmul.f32 %v3159_v42, %v2332_v23 }
 0x761   : > { %3168 = vpow2.f32 %v2763_v29  ;;  %v2764_v13 = vmul.f32 -1.442695, %v2398_v54  ;;  %v2491_v29 = vld [vmem:[%s4635_s16] sm:$0x1] }
 0x762   : > { %3170 = vpow2.f32 %v2761_v30  ;;  %v2762_v15 = vmul.f32 -1.442695, %v2396_v31 }
 0x763   : > { %v3161_v39 = vpop.eup %3160  ;;  %3172 = vpow2.f32 %v2764_v13 }
 0x764   : > { %v3163_v18 = vpop.eup %3162  ;;  %v2425_v61 = vadd.f32 1.0, %v3161_v39  ;;  %3174 = vpow2.f32 %v2762_v15 }
 0x765   : > { %v3165_v63 = vpop.eup %3164  ;;  %v2423_v48 = vadd.f32 1.0, %v3163_v18  ;;  %v2560_v18 = vld [vmem:[%s4637_s18] sm:$0x1] }
 0x766   : > { %v3167_v14 = vpop.eup %3166  ;;  %3176 = vrcp.f32 %v2425_v61  ;;  %v2426_v10 = vadd.f32 1.0, %v3165_v63 }
 0x767   : > { %3178 = vrcp.f32 %v2423_v48  ;;  %v2424_v56 = vadd.f32 1.0, %v3167_v14 }
 0x768   : > { %3180 = vrcp.f32 %v2426_v10 }
 0x769   : > { %3182 = vrcp.f32 %v2424_v56 }
 0x76b   : > { %v3169_v45 = vpop.eup %3168 }
 0x76c   : > { %v3171_v52 = vpop.eup %3170  ;;  %v2429_v53 = vadd.f32 1.0, %v3169_v45 }
 0x76d   : > { %v3173_v58 = vpop.eup %3172  ;;  %v2427_v5 = vadd.f32 1.0, %v3171_v52 }
 0x76e   : > { %v3175_v11 = vpop.eup %3174  ;;  %3184 = vrcp.f32 %v2429_v53  ;;  %v2430_v43 = vadd.f32 1.0, %v3173_v58 }
 0x76f   : > { %3186 = vrcp.f32 %v2427_v5  ;;  %v2428_v12 = vadd.f32 1.0, %v3175_v11 }
 0x770   : > { %v3177_v47 = vpop.eup %3176  ;;  %3188 = vrcp.f32 %v2430_v43 }
 0x771   : > { %v3179_v0 = vpop.eup %3178  ;;  %3190 = vrcp.f32 %v2428_v12  ;;  %v2449_v23 = vmul.f32 %v3177_v47, %v2393_v51 }
 0x772   : > { %v3181_v40 = vpop.eup %3180  ;;  %v2447_v8 = vmul.f32 %v3179_v0, %v2391_v6 }
 0x773   : > { %v3183_v33 = vpop.eup %3182  ;;  %v2450_v32 = vmul.f32 %v3181_v40, %v2394_v27  ;;  %v2459_v19 = vsel %vm2455_vm2, %v2449_v23, 0.0 }
 0x774   : > { %v2448_v36 = vmul.f32 %v3183_v33, %v2392_v4  ;;  %v2456_v20 = vsel %vm2455_vm2, %v2447_v8, 0.0 }
 0x775   : > { %v2461_v38 = vsel %vm2455_vm2, %v2450_v32, 0.0 }
 0x776   : > { %v2457_v50 = vsel %vm2455_vm2, %v2448_v36, 0.0 }
 0x777   : > { %v2458_v17 = vadd.f32 %v2457_v50, %v2456_v20 }
 0x778   : > { %v3185_v62 = vpop.eup %3184 }
 0x779   : > { %v3187_v35 = vpop.eup %3186  ;;  %v2460_v22 = vadd.f32 %v2459_v19, %v2458_v17  ;;  %v2453_v34 = vmul.f32 %v3185_v62, %v2397_v55 }
 0x77a   : > { %v3189_v59 = vpop.eup %3188  ;;  %v2451_v21 = vmul.f32 %v3187_v35, %v2395_v41  ;;  %v2550_v41 = vld [vmem:[%s4636_s17 + $0x78] sm:$0xff] }
 0x77b   : > { %v3191_v24 = vpop.eup %3190  ;;  %v2462_v1 = vadd.f32 %v2461_v38, %v2460_v22  ;;  %v2454_v7 = vmul.f32 %v3189_v59, %v2398_v54  ;;  %v2467_v25 = vsel %vm2455_vm2, %v2453_v34, 0.0  ;;  %v2559_v42 = vpack.c.bf16 %v2550_v41, %v2549_v16 }
 0x77c   : > { %v2463_v46 = vsel %vm2455_vm2, %v2451_v21, 0.0  ;;  %v2452_v60 = vmul.f32 %v3191_v24, %v2396_v31 }
 0x77d   : > { %v2464_v49 = vadd.f32 %v2463_v46, %v2462_v1  ;;  %v2469_v26 = vsel %vm2455_vm2, %v2454_v7, 0.0  ;;  %2898 = vmatpush3.bf16.msra.mxu0 %v2559_v42 }
 0x77e   : > { %v2465_v57 = vsel %vm2455_vm2, %v2452_v60, 0.0 }
 0x77f   : > { %v2466_v51 = vadd.f32 %v2465_v57, %v2464_v49 }
 0x781   : > { %v2468_v6 = vadd.f32 %v2467_v25, %v2466_v51 }
 0x783   : > { %v2470_v37 = vadd.f32 %v2469_v26, %v2468_v6 }
 0x785   : > { %v2471_v27 = vrot.slane %v2470_v37, 4 }
 0x787   : > { %v2472_v44 = vadd.f32 %v2471_v27, %v2470_v37 }
 0x789   : > { %v2473_v4 = vrot.slane %v2472_v44, 2 }
 0x78b   : > { %v2474_v9 = vadd.f32 %v2473_v4, %v2472_v44 }
 0x78d   : > { %v2475_v3 = vrot.slane %v2474_v9, 1 }
 0x78f   : > { %v2476_v28 = vadd.f32 %v2475_v3, %v2474_v9 }
 0x791   : > { %v2477_v2 = vmul.f32 0.015625, %v2476_v28 }
 0x793   : > { %v2486_v55 = vpack.c.bf16 %v2477_v2, %v2477_v2 }
 0x795   : > { %2880 = vmatmul.mubr.msk.bf16.vlgmr.msra.gmra.mrb[24].mxu1 %vm2455_vm2, %v2486_v55 }
 0x868   : > { %v2529_v54 = vpop.f32.mrb[24].mxu1 }
 0x869   : > { %v2530_v30 = vadd.f32 %v2529_v54, %v2491_v29  ;;  %v2881_v31 = vpop.f32.mrb[25].mxu1 }
 0x86a   : > { %v2532_v13 = vpop.f32.mrb[26].mxu1 }
 0x86b   : > { %v2551_v15 = vpack.c.bf16 %v2530_v30, %v2530_v30  ;;  %v2882_v39 = vpop.f32.mrb[27].mxu1 }
 0x86d   : > { %2900 = vmatmul.mubr.bf16.vlgmr.msra.gmra.mrb[16].mxu0 %v2551_v15 }
 0x940   : > { %v2595_v61 = vpop.f32.mrb[16].mxu0 }
 0x941   : > { %v2596_v63 = vadd.f32 %v2595_v61, %v2560_v18  ;;  %v2901_v48 = vpop.f32.mrb[17].mxu0 }
 0x942   : > { %v2598_v14 = vpop.f32.mrb[18].mxu0 }
 0x943   : > { %v2902_v10 = vpop.f32.mrb[19].mxu0  ;;  %v2602_v56 = vsel %vm2601_vm3, %v2596_v63, -inf }
 0x944   : > { %2603 = vmax.xlane.f32.xlu0 %v2602_v56 }
 0x9d1   : > { %v2604_v45 = vpop.xlane.xlu0 %2603 }
 0x9d2   : > { %v2605_v52 = vsub.f32 %v2596_v63, %v2604_v45 }
 0x9d4   : > { %v2606_v53 = vmul.f32 1.442695, %v2605_v52 }
 0x9d6   : > { %3192 = vpow2.f32 %v2606_v53 }
 0x9e0   : > { %v3193_v58 = vpop.eup %3192 }
 0x9e1   : > { %v2608_v5 = vsel %vm2601_vm3, %v3193_v58, 0.0 }
 0x9e2   : > { %2609 = vadd.xlane.f32.xlu1 %v2608_v5 }
 0xa6f   : > { %v2610_v11 = vpop.xlane.xlu1 %2609 }
 0xa70   : > { %3194 = vrcp.f32 %v2610_v11 }
 0xa7a   : > { %v3195_v43 = vpop.eup %3194 }
 0xa7b   : > { %v2612_v12 = vmul.f32 %v3195_v43, %v3193_v58 }
 0xa7d   : > { %2613 = vst.msk [vmem:[%s594_s27] sm:$0x1] %vm2601_vm3, %v2612_v12 }
 0xa7e   : > { %3209 = shalt.err (!%p3206_p3)
}
 0xa7f   : > { %s3210_s28 = scalar_lea.hbm %s4576_s23, 16  ;;  %s3214_s4 = scalar_lea.hbm %s4638_s19, 32 }
 0xa80   : > { %p3211_p4 = scmp.ne.s32.totalorder %s4576_s23, %s3210_s28  ;;  %p3215_p9 = scmp.lt.u32.totalorder %s4576_s23, %s4638_s19 }
 0xa81   : > { %p3216_p10 = scmp.lt.u32.totalorder %s3214_s4, %s3210_s28  ;;  %p3218_p12 = scmp.lt.u32.totalorder %s3210_s28, %s4576_s23 }
 0xa82   : > { %p3212_p7 = pnand %p3211_p4, %p3403_p5 }
 0xa83   : > { %p3217_p11 = por %p3216_p10, %p3215_p9 }
 0xa84   : > { %p3213_p8 = pneg %p3212_p7 }
 0xa85   : > { %p3219_p13 = por %p3218_p12, %p3217_p11 }
 0xa87   : > { %p3220_p0 = pnand %p3219_p13, %p3213_p8 }
 0xa89   : > { %3223 = shalt.err (!%p3220_p0)
}
 0xa8a   : > { %2909 = dma.vmem_to_hbm [thread:$0]  (%p3403_p5), %s4578_s24, 16, %s4576_s23, %s2615_s20  }
 0xa8b PF: > { %p2915_p1 = scmp.ge.s32.totalorder %s3258_s21, 2  ;;  %s2639_s6 = sand.u32 1, %s3246_s0  }
 0xa8c   : > { %s2640_s25 = scalar_lea.sflag [#allocation4], %s2639_s6 }
 0xa8d   : > { %p2912_p2 = pnand %p2915_p1, %p3407_p6 }
 0xa8f   : > { %3241 = dma.done.wait (!%p2912_p2), %s2640_s25, 16  }
 0xa90   : > { %3243 = vsyncadd (!%p2912_p2), %s2640_s25, 4294967280  ;;  %s4728_s5 = sld [smem:[#allocation6_spill]]  ;;  %s4729_s20 = sld [smem:[#allocation7_spill]] }
 0xa91   : > { %p29_p3 = scmp.ge.s32.totalorder %s3390_s2, 4   ;;  %s4730_s0 = smov %s3250_s30 }
 0xa92   : > { %s4732_s21 = smov %s3390_s2 }
 0xa93   :  { %31 = sbr.rel (!%p29_p3) target bundleno = 11 (0xb), region = 136 }
 0xa96   : > { %s4731_s30 = smov %s4728_s5 }
 0xa9a   :  { %2644 = vsyncpa [#allocation4], 1 }
 0xa9b   :  { %2646 = vsyncpa [#allocation4 + $0x1], 1 }

</bundles_post_ra>
